<compile_context>
chip_gen: v7x
topology: tpu7x:2x2x1
jax: 0.10.0
libtpu: 0.0.40
codegen_flags: <defaults>
</compile_context>

<pallas_src>
import jax
import jax.numpy as jnp
import numpy as np
from jax.experimental import pallas as pl
from jax.experimental.pallas import tpu as pltpu

LRELU_SLOPE = 0.01  # F.leaky_relu default
LANE = 128


def _lrelu(x):
    return jnp.where(x > 0, x, LRELU_SLOPE * x)


def _round_up(n, m):
    return ((n + m - 1) // m) * m


def _pad_last(x, target):
    pad = target - x.shape[-1]
    if pad == 0:
        return x
    cfg = [(0, 0)] * (x.ndim - 1) + [(0, pad)]
    return jnp.pad(x, cfg)


def _pad_last2(x, t0, t1):
    p0 = t0 - x.shape[-2]
    p1 = t1 - x.shape[-1]
    if p0 == 0 and p1 == 0:
        return x
    cfg = [(0, 0)] * (x.ndim - 2) + [(0, p0), (0, p1)]
    return jnp.pad(x, cfg)


def gcn_kernel(
    a_enc_ref,   # (5, N, N)   bf16  encoder adjacencies [A_ori, A_WL1..4]
    x_ref,       # (N, Fp)     bf16  node features (lane padded)
    we_t_ref,    # (5, Fp, Fp) bf16  encoder_i weights, pre-transposed (in,out)
    wee_t_ref,   # (5, Fp, Fp) bf16  encoder_ii weights, pre-transposed
    bee_ref,     # (5, 1, Fp)  f32   encoder_ii biases
    a_dec_ref,   # (5, N, N)   bf16  decoder adjacencies [A_WL_I_0..4]
    wd_t_ref,    # (5, Fp, Fep)bf16  decoder_i weights, pre-transposed
    bd_ref,      # (5, 1, Fep) f32   decoder_i biases
    wdd_t_ref,   # (5, Fep, Fp)bf16  decoder_ii weights, pre-transposed
    bdd_ref,     # (5, 1, Fp)  f32   decoder_ii biases
    wc_t_ref,    # (5, Fp, Fp) bf16  per-branch chunk of concat weight (transposed)
    bc_ref,      # (1, Fp)     f32   concat bias
    c_out_ref,   # (5, N, Fp)  f32   per-branch C_i outputs
    z_out_ref,   # (N, Fp)     f32   final Z output
):
    # Everything is VMEM-resident; single invocation, branches unrolled with
    # static indices so all matmuls are visible to the scheduler at once.
    xb = x_ref[...]                                   # (N, Fp) bf16
    acc = None
    for i in range(5):
        # Encoder path: C_i = lrelu(enc_ii(lrelu(enc_i(A_i @ X))))
        h = jnp.dot(a_enc_ref[i], xb, preferred_element_type=jnp.float32)
        c = _lrelu(jnp.dot(h.astype(jnp.bfloat16), we_t_ref[i],
                           preferred_element_type=jnp.float32))
        c = _lrelu(jnp.dot(c.astype(jnp.bfloat16), wee_t_ref[i],
                           preferred_element_type=jnp.float32) + bee_ref[i])
        c_out_ref[i] = c.astype(c_out_ref.dtype)

        # Decoder path: Z_i = lrelu(dec_ii(lrelu(dec_i(A_I_i @ C_i))))
        m = jnp.dot(a_dec_ref[i], c.astype(jnp.bfloat16),
                    preferred_element_type=jnp.float32)
        d = _lrelu(jnp.dot(m.astype(jnp.bfloat16), wd_t_ref[i],
                           preferred_element_type=jnp.float32) + bd_ref[i])
        z = _lrelu(jnp.dot(d.astype(jnp.bfloat16), wdd_t_ref[i],
                           preferred_element_type=jnp.float32) + bdd_ref[i])

        # Fused "concat" Linear: cat(Z0..Z4) @ Wc.T == sum_i Zi @ Wc_i.T
        part = jnp.dot(z.astype(jnp.bfloat16), wc_t_ref[i],
                       preferred_element_type=jnp.float32)
        acc = part if acc is None else acc + part

    z_out_ref[...] = _lrelu(acc + bc_ref[...]).astype(z_out_ref.dtype)


@jax.jit
def gcn_forward_pallas(params, A_enc, X, A_dec):
    """A_enc: (5,N,N) stacked [A_ori, A_WL1..4]; A_dec: (5,N,N) [A_WL_I_0..4]."""
    N, F = X.shape
    Fe = params["wd_t"].shape[-1]
    Fp = _round_up(F, LANE)     # 116 -> 128
    Fep = _round_up(Fe, LANE)   # 80  -> 128

    bf16 = jnp.bfloat16
    # Host-side lane padding + bf16 cast of the MXU operands. Biases stay f32.
    a_enc = A_enc.astype(bf16)
    a_dec = A_dec.astype(bf16)
    x_p = _pad_last(X, Fp).astype(bf16)
    we_t = _pad_last2(params["we_t"], Fp, Fp).astype(bf16)
    wee_t = _pad_last2(params["wee_t"], Fp, Fp).astype(bf16)
    wd_t = _pad_last2(params["wd_t"], Fp, Fep).astype(bf16)
    wdd_t = _pad_last2(params["wdd_t"], Fep, Fp).astype(bf16)
    wc_t = _pad_last2(params["wc_t"], Fp, Fp).astype(bf16)
    bee = _pad_last(params["bee"], Fp)[:, None, :]    # (5,1,Fp) f32
    bd = _pad_last(params["bd"], Fep)[:, None, :]     # (5,1,Fep) f32
    bdd = _pad_last(params["bdd"], Fp)[:, None, :]    # (5,1,Fp) f32
    bc = _pad_last(params["bc"], Fp)                  # (1,Fp)  f32

    vmem_spec = pl.BlockSpec(memory_space=pltpu.MemorySpace.VMEM)

    c_all, z = pl.pallas_call(
        gcn_kernel,
        out_shape=(
            jax.ShapeDtypeStruct((5, N, Fp), jnp.float32),
            jax.ShapeDtypeStruct((N, Fp), jnp.float32),
        ),
        in_specs=[vmem_spec] * 12,
        out_specs=(vmem_spec, vmem_spec),
    )(
        a_enc, x_p, we_t, wee_t, bee,
        a_dec, wd_t, bd, wdd_t, bdd,
        wc_t, bc,
    )

    # Slice the lane padding back off.  Matches torch return:
    # (lrelu(Z), C0, C1, C2, C3, C4)
    return (
        z[:, :F],
        c_all[0, :, :F], c_all[1, :, :F], c_all[2, :, :F],
        c_all[3, :, :F], c_all[4, :, :F],
    )


def gcn_forward_ref(params, A_enc, X, A_dec):
    """Pure-JAX f32 reference mirroring the PyTorch forward, for validation."""
    cs, zs = [], []
    for i in range(5):
        H = A_enc[i] @ X
        C = _lrelu(H @ params["we_t"][i])
        C = _lrelu(C @ params["wee_t"][i] + params["bee"][i])
        cs.append(C)
        M = A_dec[i] @ C
        D = _lrelu(M @ params["wd_t"][i] + params["bd"][i])
        Z = _lrelu(D @ params["wdd_t"][i] + params["bdd"][i])
        zs.append(Z)
    acc = sum(zs[i] @ params["wc_t"][i] for i in range(5)) + params["bc"][0]
    return (_lrelu(acc), *cs)


def init_params(key, dim_in):
    """Deterministic synthetic parameters matching the nn.Module shapes."""
    c, d, e = 29, 29, 20
    F = dim_in * 29          # = dim_in * c = dim_in * d
    Fe = dim_in * e

    keys = jax.random.split(key, 32)
    k = iter(keys)

    def rnd(shape, scale=0.1):
        return scale * jax.random.normal(next(k), shape, dtype=jnp.float32)

    # encoder_0..4 : Linear(F, F, bias=False)           -> weight (F, F)
    we = rnd((5, F, F))
    # encoder_00..44 : Linear(F, F, bias=True)
    wee = rnd((5, F, F))
    bee = rnd((5, F))
    # NOTE: the PyTorch forward applies encoder_33 to BOTH C3 and C4.
    wee = wee.at[4].set(wee[3])
    bee = bee.at[4].set(bee[3])
    # decoder_0..4 : Linear(F, Fe, bias=True)           -> weight (Fe, F)
    wd = rnd((5, Fe, F))
    bd = rnd((5, Fe))
    # decoder_00..44 : Linear(Fe, F, bias=True)         -> weight (F, Fe)
    wdd = rnd((5, F, Fe))
    bdd = rnd((5, F))
    # concat : Linear(5F, F, bias=True)                 -> weight (F, 5F)
    wc = rnd((F, 5 * F))
    bc = rnd((1, F))

    # Pre-transpose weights to (in, out) so the kernel does x @ W_t directly,
    # and split the concat weight into per-branch chunks.
    wc_t = jnp.stack(
        [wc[:, i * F:(i + 1) * F].T for i in range(5)], axis=0
    )  # (5, F, F)
    return {
        "we_t": jnp.transpose(we, (0, 2, 1)),
        "wee_t": jnp.transpose(wee, (0, 2, 1)),
        "bee": bee,
        "wd_t": jnp.transpose(wd, (0, 2, 1)),
        "bd": bd,
        "wdd_t": jnp.transpose(wdd, (0, 2, 1)),
        "bdd": bdd,
        "wc_t": wc_t,
        "bc": bc,
    }


if __name__ == "__main__":
    dim_in = 4                 # feature dim F = dim_in * 29 = 116 (padded to 128)
    num_nodes = 16             # max_num_nodes (rows of every adjacency matrix)
    F = dim_in * 29

    key = jax.random.PRNGKey(0)
    kp, kx, ka = jax.random.split(key, 3)
    params = init_params(kp, dim_in)

    X = jax.random.normal(kx, (num_nodes, F), dtype=jnp.float32)
    a_keys = jax.random.split(ka, 10)
    # Encoder adjacencies (branch order): A_ori, A_WL1, A_WL2, A_WL3, A_WL4
    A_enc = jnp.stack(
        [jax.random.normal(a_keys[i], (num_nodes, num_nodes), jnp.float32) * 0.1
         for i in range(5)],
        axis=0,
    )
    # Decoder adjacencies (branch order): A_WL_I_0 .. A_WL_I_4
    A_dec = jnp.stack(
        [jax.random.normal(a_keys[5 + i], (num_nodes, num_nodes), jnp.float32) * 0.1
         for i in range(5)],
        axis=0,
    )

    out = gcn_forward_pallas(params, A_enc, X, A_dec)
    out = jax.block_until_ready(out)

    ref = gcn_forward_ref(params, A_enc, X, A_dec)
    # Tolerance accounts for bf16 matmul operands (f32 accumulation) vs the
    # pure-f32 reference through a chain of ~7 matmuls.
    for got, want in zip(out, ref):
        np.testing.assert_allclose(
            np.asarray(got), np.asarray(want), rtol=3e-2, atol=3e-2
        )

    print("KERNEL_OK")
</pallas_src>

<mosaic_0001>
module attributes {stable_mosaic.version = 11 : i64} {
  func.func @gcn_kernel(%arg0: memref<5x16x16xbf16, #tpu.memory_space<vmem>>, %arg1: memref<16x128xbf16, #tpu.memory_space<vmem>>, %arg2: memref<5x128x128xbf16, #tpu.memory_space<vmem>>, %arg3: memref<5x128x128xbf16, #tpu.memory_space<vmem>>, %arg4: memref<5x1x128xf32, #tpu.memory_space<vmem>>, %arg5: memref<5x16x16xbf16, #tpu.memory_space<vmem>>, %arg6: memref<5x128x128xbf16, #tpu.memory_space<vmem>>, %arg7: memref<5x1x128xf32, #tpu.memory_space<vmem>>, %arg8: memref<5x128x128xbf16, #tpu.memory_space<vmem>>, %arg9: memref<5x1x128xf32, #tpu.memory_space<vmem>>, %arg10: memref<5x128x128xbf16, #tpu.memory_space<vmem>>, %arg11: memref<1x128xf32, #tpu.memory_space<vmem>>, %arg12: memref<5x16x128xf32, #tpu.memory_space<vmem>>, %arg13: memref<16x128xf32, #tpu.memory_space<vmem>>) attributes {dimension_semantics = [], scalar_prefetch = 0 : i64, scratch_operands = 0 : i64, tpu.core_type = #tpu.core_type<tc>} {
    %c0 = arith.constant 0 : index
    %c0_0 = arith.constant 0 : index
    %0 = vector.load %arg1[%c0, %c0_0] : memref<16x128xbf16, #tpu.memory_space<vmem>>, vector<16x128xbf16>
    %c0_1 = arith.constant 0 : index
    %c0_2 = arith.constant 0 : index
    %c0_3 = arith.constant 0 : index
    %1 = vector.load %arg0[%c0_1, %c0_2, %c0_3] : memref<5x16x16xbf16, #tpu.memory_space<vmem>>, vector<1x16x16xbf16>
    %2 = vector.shape_cast %1 : vector<1x16x16xbf16> to vector<16x16xbf16>
    %cst = arith.constant dense<0.000000e+00> : vector<16x128xf32>
    %3 = tpu.matmul %2, %0, %cst {dimension_numbers = #tpu.dot_dimension_numbers<[1], [0], [0], [1], [0, 0, 1, 1], [], []>} : vector<16x16xbf16>, vector<16x128xbf16>, vector<16x128xf32> -> vector<16x128xf32>
    %4 = arith.truncf %3 : vector<16x128xf32> to vector<16x128xbf16>
    %c0_4 = arith.constant 0 : index
    %c0_5 = arith.constant 0 : index
    %c0_6 = arith.constant 0 : index
    %5 = vector.load %arg2[%c0_4, %c0_5, %c0_6] : memref<5x128x128xbf16, #tpu.memory_space<vmem>>, vector<1x128x128xbf16>
    %6 = vector.shape_cast %5 : vector<1x128x128xbf16> to vector<128x128xbf16>
    %cst_7 = arith.constant dense<0.000000e+00> : vector<16x128xf32>
    %7 = tpu.matmul %4, %6, %cst_7 {dimension_numbers = #tpu.dot_dimension_numbers<[1], [0], [0], [1], [0, 0, 1, 1], [], []>} : vector<16x128xbf16>, vector<128x128xbf16>, vector<16x128xf32> -> vector<16x128xf32>
    %cst_8 = arith.constant 0.000000e+00 : f32
    %8 = vector.broadcast %cst_8 : f32 to vector<16x128xf32>
    %9 = arith.cmpf ogt, %7, %8 : vector<16x128xf32>
    %cst_9 = arith.constant 0.00999999977 : f32
    %10 = vector.broadcast %cst_9 : f32 to vector<16x128xf32>
    %11 = arith.mulf %10, %7 : vector<16x128xf32>
    %12 = arith.select %9, %7, %11 : vector<16x128xi1>, vector<16x128xf32>
    %13 = arith.truncf %12 : vector<16x128xf32> to vector<16x128xbf16>
    %c0_10 = arith.constant 0 : index
    %c0_11 = arith.constant 0 : index
    %c0_12 = arith.constant 0 : index
    %14 = vector.load %arg3[%c0_10, %c0_11, %c0_12] : memref<5x128x128xbf16, #tpu.memory_space<vmem>>, vector<1x128x128xbf16>
    %15 = vector.shape_cast %14 : vector<1x128x128xbf16> to vector<128x128xbf16>
    %cst_13 = arith.constant dense<0.000000e+00> : vector<16x128xf32>
    %16 = tpu.matmul %13, %15, %cst_13 {dimension_numbers = #tpu.dot_dimension_numbers<[1], [0], [0], [1], [0, 0, 1, 1], [], []>} : vector<16x128xbf16>, vector<128x128xbf16>, vector<16x128xf32> -> vector<16x128xf32>
    %c0_14 = arith.constant 0 : index
    %c0_15 = arith.constant 0 : index
    %c0_16 = arith.constant 0 : index
    %17 = vector.load %arg4[%c0_14, %c0_15, %c0_16] : memref<5x1x128xf32, #tpu.memory_space<vmem>>, vector<1x1x128xf32>
    %18 = vector.shape_cast %17 : vector<1x1x128xf32> to vector<1x128xf32>
    %19 = vector.broadcast %18 : vector<1x128xf32> to vector<16x128xf32>
    %20 = arith.addf %16, %19 : vector<16x128xf32>
    %cst_17 = arith.constant 0.000000e+00 : f32
    %21 = vector.broadcast %cst_17 : f32 to vector<16x128xf32>
    %22 = arith.cmpf ogt, %20, %21 : vector<16x128xf32>
    %cst_18 = arith.constant 0.00999999977 : f32
    %23 = vector.broadcast %cst_18 : f32 to vector<16x128xf32>
    %24 = arith.mulf %23, %20 : vector<16x128xf32>
    %25 = arith.select %22, %20, %24 : vector<16x128xi1>, vector<16x128xf32>
    %c0_19 = arith.constant 0 : index
    %c0_20 = arith.constant 0 : index
    %c0_21 = arith.constant 0 : index
    %26 = vector.load %arg12[%c0_19, %c0_20, %c0_21] : memref<5x16x128xf32, #tpu.memory_space<vmem>>, vector<1x16x128xf32>
    %27 = vector.shape_cast %26 : vector<1x16x128xf32> to vector<16x128xf32>
    %28 = vector.shape_cast %25 : vector<16x128xf32> to vector<1x16x128xf32>
    tpu.vector_store %arg12[%c0_19, %c0_20, %c0_21], %28 {strides = array<i32>} : memref<5x16x128xf32, #tpu.memory_space<vmem>>, vector<1x16x128xf32>,
    %c0_22 = arith.constant 0 : index
    %c0_23 = arith.constant 0 : index
    %c0_24 = arith.constant 0 : index
    %29 = vector.load %arg5[%c0_22, %c0_23, %c0_24] : memref<5x16x16xbf16, #tpu.memory_space<vmem>>, vector<1x16x16xbf16>
    %30 = vector.shape_cast %29 : vector<1x16x16xbf16> to vector<16x16xbf16>
    %31 = arith.truncf %25 : vector<16x128xf32> to vector<16x128xbf16>
    %cst_25 = arith.constant dense<0.000000e+00> : vector<16x128xf32>
    %32 = tpu.matmul %30, %31, %cst_25 {dimension_numbers = #tpu.dot_dimension_numbers<[1], [0], [0], [1], [0, 0, 1, 1], [], []>} : vector<16x16xbf16>, vector<16x128xbf16>, vector<16x128xf32> -> vector<16x128xf32>
    %33 = arith.truncf %32 : vector<16x128xf32> to vector<16x128xbf16>
    %c0_26 = arith.constant 0 : index
    %c0_27 = arith.constant 0 : index
    %c0_28 = arith.constant 0 : index
    %34 = vector.load %arg6[%c0_26, %c0_27, %c0_28] : memref<5x128x128xbf16, #tpu.memory_space<vmem>>, vector<1x128x128xbf16>
    %35 = vector.shape_cast %34 : vector<1x128x128xbf16> to vector<128x128xbf16>
    %cst_29 = arith.constant dense<0.000000e+00> : vector<16x128xf32>
    %36 = tpu.matmul %33, %35, %cst_29 {dimension_numbers = #tpu.dot_dimension_numbers<[1], [0], [0], [1], [0, 0, 1, 1], [], []>} : vector<16x128xbf16>, vector<128x128xbf16>, vector<16x128xf32> -> vector<16x128xf32>
    %c0_30 = arith.constant 0 : index
    %c0_31 = arith.constant 0 : index
    %c0_32 = arith.constant 0 : index
    %37 = vector.load %arg7[%c0_30, %c0_31, %c0_32] : memref<5x1x128xf32, #tpu.memory_space<vmem>>, vector<1x1x128xf32>
    %38 = vector.shape_cast %37 : vector<1x1x128xf32> to vector<1x128xf32>
    %39 = vector.broadcast %38 : vector<1x128xf32> to vector<16x128xf32>
    %40 = arith.addf %36, %39 : vector<16x128xf32>
    %cst_33 = arith.constant 0.000000e+00 : f32
    %41 = vector.broadcast %cst_33 : f32 to vector<16x128xf32>
    %42 = arith.cmpf ogt, %40, %41 : vector<16x128xf32>
    %cst_34 = arith.constant 0.00999999977 : f32
    %43 = vector.broadcast %cst_34 : f32 to vector<16x128xf32>
    %44 = arith.mulf %43, %40 : vector<16x128xf32>
    %45 = arith.select %42, %40, %44 : vector<16x128xi1>, vector<16x128xf32>
    %46 = arith.truncf %45 : vector<16x128xf32> to vector<16x128xbf16>
    %c0_35 = arith.constant 0 : index
    %c0_36 = arith.constant 0 : index
    %c0_37 = arith.constant 0 : index
    %47 = vector.load %arg8[%c0_35, %c0_36, %c0_37] : memref<5x128x128xbf16, #tpu.memory_space<vmem>>, vector<1x128x128xbf16>
    %48 = vector.shape_cast %47 : vector<1x128x128xbf16> to vector<128x128xbf16>
    %cst_38 = arith.constant dense<0.000000e+00> : vector<16x128xf32>
    %49 = tpu.matmul %46, %48, %cst_38 {dimension_numbers = #tpu.dot_dimension_numbers<[1], [0], [0], [1], [0, 0, 1, 1], [], []>} : vector<16x128xbf16>, vector<128x128xbf16>, vector<16x128xf32> -> vector<16x128xf32>
    %c0_39 = arith.constant 0 : index
    %c0_40 = arith.constant 0 : index
    %c0_41 = arith.constant 0 : index
    %50 = vector.load %arg9[%c0_39, %c0_40, %c0_41] : memref<5x1x128xf32, #tpu.memory_space<vmem>>, vector<1x1x128xf32>
    %51 = vector.shape_cast %50 : vector<1x1x128xf32> to vector<1x128xf32>
    %52 = vector.broadcast %51 : vector<1x128xf32> to vector<16x128xf32>
    %53 = arith.addf %49, %52 : vector<16x128xf32>
    %cst_42 = arith.constant 0.000000e+00 : f32
    %54 = vector.broadcast %cst_42 : f32 to vector<16x128xf32>
    %55 = arith.cmpf ogt, %53, %54 : vector<16x128xf32>
    %cst_43 = arith.constant 0.00999999977 : f32
    %56 = vector.broadcast %cst_43 : f32 to vector<16x128xf32>
    %57 = arith.mulf %56, %53 : vector<16x128xf32>
    %58 = arith.select %55, %53, %57 : vector<16x128xi1>, vector<16x128xf32>
    %59 = arith.truncf %58 : vector<16x128xf32> to vector<16x128xbf16>
    %c0_44 = arith.constant 0 : index
    %c0_45 = arith.constant 0 : index
    %c0_46 = arith.constant 0 : index
    %60 = vector.load %arg10[%c0_44, %c0_45, %c0_46] : memref<5x128x128xbf16, #tpu.memory_space<vmem>>, vector<1x128x128xbf16>
    %61 = vector.shape_cast %60 : vector<1x128x128xbf16> to vector<128x128xbf16>
    %cst_47 = arith.constant dense<0.000000e+00> : vector<16x128xf32>
    %62 = tpu.matmul %59, %61, %cst_47 {dimension_numbers = #tpu.dot_dimension_numbers<[1], [0], [0], [1], [0, 0, 1, 1], [], []>} : vector<16x128xbf16>, vector<128x128xbf16>, vector<16x128xf32> -> vector<16x128xf32>
    %c1 = arith.constant 1 : index
    %c0_48 = arith.constant 0 : index
    %c0_49 = arith.constant 0 : index
    %63 = vector.load %arg0[%c1, %c0_48, %c0_49] : memref<5x16x16xbf16, #tpu.memory_space<vmem>>, vector<1x16x16xbf16>
    %64 = vector.shape_cast %63 : vector<1x16x16xbf16> to vector<16x16xbf16>
    %cst_50 = arith.constant dense<0.000000e+00> : vector<16x128xf32>
    %65 = tpu.matmul %64, %0, %cst_50 {dimension_numbers = #tpu.dot_dimension_numbers<[1], [0], [0], [1], [0, 0, 1, 1], [], []>} : vector<16x16xbf16>, vector<16x128xbf16>, vector<16x128xf32> -> vector<16x128xf32>
    %66 = arith.truncf %65 : vector<16x128xf32> to vector<16x128xbf16>
    %c1_51 = arith.constant 1 : index
    %c0_52 = arith.constant 0 : index
    %c0_53 = arith.constant 0 : index
    %67 = vector.load %arg2[%c1_51, %c0_52, %c0_53] : memref<5x128x128xbf16, #tpu.memory_space<vmem>>, vector<1x128x128xbf16>
    %68 = vector.shape_cast %67 : vector<1x128x128xbf16> to vector<128x128xbf16>
    %cst_54 = arith.constant dense<0.000000e+00> : vector<16x128xf32>
    %69 = tpu.matmul %66, %68, %cst_54 {dimension_numbers = #tpu.dot_dimension_numbers<[1], [0], [0], [1], [0, 0, 1, 1], [], []>} : vector<16x128xbf16>, vector<128x128xbf16>, vector<16x128xf32> -> vector<16x128xf32>
    %cst_55 = arith.constant 0.000000e+00 : f32
    %70 = vector.broadcast %cst_55 : f32 to vector<16x128xf32>
    %71 = arith.cmpf ogt, %69, %70 : vector<16x128xf32>
    %cst_56 = arith.constant 0.00999999977 : f32
    %72 = vector.broadcast %cst_56 : f32 to vector<16x128xf32>
    %73 = arith.mulf %72, %69 : vector<16x128xf32>
    %74 = arith.select %71, %69, %73 : vector<16x128xi1>, vector<16x128xf32>
    %75 = arith.truncf %74 : vector<16x128xf32> to vector<16x128xbf16>
    %c1_57 = arith.constant 1 : index
    %c0_58 = arith.constant 0 : index
    %c0_59 = arith.constant 0 : index
    %76 = vector.load %arg3[%c1_57, %c0_58, %c0_59] : memref<5x128x128xbf16, #tpu.memory_space<vmem>>, vector<1x128x128xbf16>
    %77 = vector.shape_cast %76 : vector<1x128x128xbf16> to vector<128x128xbf16>
    %cst_60 = arith.constant dense<0.000000e+00> : vector<16x128xf32>
    %78 = tpu.matmul %75, %77, %cst_60 {dimension_numbers = #tpu.dot_dimension_numbers<[1], [0], [0], [1], [0, 0, 1, 1], [], []>} : vector<16x128xbf16>, vector<128x128xbf16>, vector<16x128xf32> -> vector<16x128xf32>
    %c1_61 = arith.constant 1 : index
    %c0_62 = arith.constant 0 : index
    %c0_63 = arith.constant 0 : index
    %79 = vector.load %arg4[%c1_61, %c0_62, %c0_63] : memref<5x1x128xf32, #tpu.memory_space<vmem>>, vector<1x1x128xf32>
    %80 = vector.shape_cast %79 : vector<1x1x128xf32> to vector<1x128xf32>
    %81 = vector.broadcast %80 : vector<1x128xf32> to vector<16x128xf32>
    %82 = arith.addf %78, %81 : vector<16x128xf32>
    %cst_64 = arith.constant 0.000000e+00 : f32
    %83 = vector.broadcast %cst_64 : f32 to vector<16x128xf32>
    %84 = arith.cmpf ogt, %82, %83 : vector<16x128xf32>
    %cst_65 = arith.constant 0.00999999977 : f32
    %85 = vector.broadcast %cst_65 : f32 to vector<16x128xf32>
    %86 = arith.mulf %85, %82 : vector<16x128xf32>
    %87 = arith.select %84, %82, %86 : vector<16x128xi1>, vector<16x128xf32>
    %c1_66 = arith.constant 1 : index
    %c0_67 = arith.constant 0 : index
    %c0_68 = arith.constant 0 : index
    %88 = vector.load %arg12[%c1_66, %c0_67, %c0_68] : memref<5x16x128xf32, #tpu.memory_space<vmem>>, vector<1x16x128xf32>
    %89 = vector.shape_cast %88 : vector<1x16x128xf32> to vector<16x128xf32>
    %90 = vector.shape_cast %87 : vector<16x128xf32> to vector<1x16x128xf32>
    tpu.vector_store %arg12[%c1_66, %c0_67, %c0_68], %90 {strides = array<i32>} : memref<5x16x128xf32, #tpu.memory_space<vmem>>, vector<1x16x128xf32>,
    %c1_69 = arith.constant 1 : index
    %c0_70 = arith.constant 0 : index
    %c0_71 = arith.constant 0 : index
    %91 = vector.load %arg5[%c1_69, %c0_70, %c0_71] : memref<5x16x16xbf16, #tpu.memory_space<vmem>>, vector<1x16x16xbf16>
    %92 = vector.shape_cast %91 : vector<1x16x16xbf16> to vector<16x16xbf16>
    %93 = arith.truncf %87 : vector<16x128xf32> to vector<16x128xbf16>
    %cst_72 = arith.constant dense<0.000000e+00> : vector<16x128xf32>
    %94 = tpu.matmul %92, %93, %cst_72 {dimension_numbers = #tpu.dot_dimension_numbers<[1], [0], [0], [1], [0, 0, 1, 1], [], []>} : vector<16x16xbf16>, vector<16x128xbf16>, vector<16x128xf32> -> vector<16x128xf32>
    %95 = arith.truncf %94 : vector<16x128xf32> to vector<16x128xbf16>
    %c1_73 = arith.constant 1 : index
    %c0_74 = arith.constant 0 : index
    %c0_75 = arith.constant 0 : index
    %96 = vector.load %arg6[%c1_73, %c0_74, %c0_75] : memref<5x128x128xbf16, #tpu.memory_space<vmem>>, vector<1x128x128xbf16>
    %97 = vector.shape_cast %96 : vector<1x128x128xbf16> to vector<128x128xbf16>
    %cst_76 = arith.constant dense<0.000000e+00> : vector<16x128xf32>
    %98 = tpu.matmul %95, %97, %cst_76 {dimension_numbers = #tpu.dot_dimension_numbers<[1], [0], [0], [1], [0, 0, 1, 1], [], []>} : vector<16x128xbf16>, vector<128x128xbf16>, vector<16x128xf32> -> vector<16x128xf32>
    %c1_77 = arith.constant 1 : index
    %c0_78 = arith.constant 0 : index
    %c0_79 = arith.constant 0 : index
    %99 = vector.load %arg7[%c1_77, %c0_78, %c0_79] : memref<5x1x128xf32, #tpu.memory_space<vmem>>, vector<1x1x128xf32>
    %100 = vector.shape_cast %99 : vector<1x1x128xf32> to vector<1x128xf32>
    %101 = vector.broadcast %100 : vector<1x128xf32> to vector<16x128xf32>
    %102 = arith.addf %98, %101 : vector<16x128xf32>
    %cst_80 = arith.constant 0.000000e+00 : f32
    %103 = vector.broadcast %cst_80 : f32 to vector<16x128xf32>
    %104 = arith.cmpf ogt, %102, %103 : vector<16x128xf32>
    %cst_81 = arith.constant 0.00999999977 : f32
    %105 = vector.broadcast %cst_81 : f32 to vector<16x128xf32>
    %106 = arith.mulf %105, %102 : vector<16x128xf32>
    %107 = arith.select %104, %102, %106 : vector<16x128xi1>, vector<16x128xf32>
    %108 = arith.truncf %107 : vector<16x128xf32> to vector<16x128xbf16>
    %c1_82 = arith.constant 1 : index
    %c0_83 = arith.constant 0 : index
    %c0_84 = arith.constant 0 : index
    %109 = vector.load %arg8[%c1_82, %c0_83, %c0_84] : memref<5x128x128xbf16, #tpu.memory_space<vmem>>, vector<1x128x128xbf16>
    %110 = vector.shape_cast %109 : vector<1x128x128xbf16> to vector<128x128xbf16>
    %cst_85 = arith.constant dense<0.000000e+00> : vector<16x128xf32>
    %111 = tpu.matmul %108, %110, %cst_85 {dimension_numbers = #tpu.dot_dimension_numbers<[1], [0], [0], [1], [0, 0, 1, 1], [], []>} : vector<16x128xbf16>, vector<128x128xbf16>, vector<16x128xf32> -> vector<16x128xf32>
    %c1_86 = arith.constant 1 : index
    %c0_87 = arith.constant 0 : index
    %c0_88 = arith.constant 0 : index
    %112 = vector.load %arg9[%c1_86, %c0_87, %c0_88] : memref<5x1x128xf32, #tpu.memory_space<vmem>>, vector<1x1x128xf32>
    %113 = vector.shape_cast %112 : vector<1x1x128xf32> to vector<1x128xf32>
    %114 = vector.broadcast %113 : vector<1x128xf32> to vector<16x128xf32>
    %115 = arith.addf %111, %114 : vector<16x128xf32>
    %cst_89 = arith.constant 0.000000e+00 : f32
    %116 = vector.broadcast %cst_89 : f32 to vector<16x128xf32>
    %117 = arith.cmpf ogt, %115, %116 : vector<16x128xf32>
    %cst_90 = arith.constant 0.00999999977 : f32
    %118 = vector.broadcast %cst_90 : f32 to vector<16x128xf32>
    %119 = arith.mulf %118, %115 : vector<16x128xf32>
    %120 = arith.select %117, %115, %119 : vector<16x128xi1>, vector<16x128xf32>
    %121 = arith.truncf %120 : vector<16x128xf32> to vector<16x128xbf16>
    %c1_91 = arith.constant 1 : index
    %c0_92 = arith.constant 0 : index
    %c0_93 = arith.constant 0 : index
    %122 = vector.load %arg10[%c1_91, %c0_92, %c0_93] : memref<5x128x128xbf16, #tpu.memory_space<vmem>>, vector<1x128x128xbf16>
    %123 = vector.shape_cast %122 : vector<1x128x128xbf16> to vector<128x128xbf16>
    %cst_94 = arith.constant dense<0.000000e+00> : vector<16x128xf32>
    %124 = tpu.matmul %121, %123, %cst_94 {dimension_numbers = #tpu.dot_dimension_numbers<[1], [0], [0], [1], [0, 0, 1, 1], [], []>} : vector<16x128xbf16>, vector<128x128xbf16>, vector<16x128xf32> -> vector<16x128xf32>
    %125 = arith.addf %62, %124 : vector<16x128xf32>
    %c2 = arith.constant 2 : index
    %c0_95 = arith.constant 0 : index
    %c0_96 = arith.constant 0 : index
    %126 = vector.load %arg0[%c2, %c0_95, %c0_96] : memref<5x16x16xbf16, #tpu.memory_space<vmem>>, vector<1x16x16xbf16>
    %127 = vector.shape_cast %126 : vector<1x16x16xbf16> to vector<16x16xbf16>
    %cst_97 = arith.constant dense<0.000000e+00> : vector<16x128xf32>
    %128 = tpu.matmul %127, %0, %cst_97 {dimension_numbers = #tpu.dot_dimension_numbers<[1], [0], [0], [1], [0, 0, 1, 1], [], []>} : vector<16x16xbf16>, vector<16x128xbf16>, vector<16x128xf32> -> vector<16x128xf32>
    %129 = arith.truncf %128 : vector<16x128xf32> to vector<16x128xbf16>
    %c2_98 = arith.constant 2 : index
    %c0_99 = arith.constant 0 : index
    %c0_100 = arith.constant 0 : index
    %130 = vector.load %arg2[%c2_98, %c0_99, %c0_100] : memref<5x128x128xbf16, #tpu.memory_space<vmem>>, vector<1x128x128xbf16>
    %131 = vector.shape_cast %130 : vector<1x128x128xbf16> to vector<128x128xbf16>
    %cst_101 = arith.constant dense<0.000000e+00> : vector<16x128xf32>
    %132 = tpu.matmul %129, %131, %cst_101 {dimension_numbers = #tpu.dot_dimension_numbers<[1], [0], [0], [1], [0, 0, 1, 1], [], []>} : vector<16x128xbf16>, vector<128x128xbf16>, vector<16x128xf32> -> vector<16x128xf32>
    %cst_102 = arith.constant 0.000000e+00 : f32
    %133 = vector.broadcast %cst_102 : f32 to vector<16x128xf32>
    %134 = arith.cmpf ogt, %132, %133 : vector<16x128xf32>
    %cst_103 = arith.constant 0.00999999977 : f32
    %135 = vector.broadcast %cst_103 : f32 to vector<16x128xf32>
    %136 = arith.mulf %135, %132 : vector<16x128xf32>
    %137 = arith.select %134, %132, %136 : vector<16x128xi1>, vector<16x128xf32>
    %138 = arith.truncf %137 : vector<16x128xf32> to vector<16x128xbf16>
    %c2_104 = arith.constant 2 : index
    %c0_105 = arith.constant 0 : index
    %c0_106 = arith.constant 0 : index
    %139 = vector.load %arg3[%c2_104, %c0_105, %c0_106] : memref<5x128x128xbf16, #tpu.memory_space<vmem>>, vector<1x128x128xbf16>
    %140 = vector.shape_cast %139 : vector<1x128x128xbf16> to vector<128x128xbf16>
    %cst_107 = arith.constant dense<0.000000e+00> : vector<16x128xf32>
    %141 = tpu.matmul %138, %140, %cst_107 {dimension_numbers = #tpu.dot_dimension_numbers<[1], [0], [0], [1], [0, 0, 1, 1], [], []>} : vector<16x128xbf16>, vector<128x128xbf16>, vector<16x128xf32> -> vector<16x128xf32>
    %c2_108 = arith.constant 2 : index
    %c0_109 = arith.constant 0 : index
    %c0_110 = arith.constant 0 : index
    %142 = vector.load %arg4[%c2_108, %c0_109, %c0_110] : memref<5x1x128xf32, #tpu.memory_space<vmem>>, vector<1x1x128xf32>
    %143 = vector.shape_cast %142 : vector<1x1x128xf32> to vector<1x128xf32>
    %144 = vector.broadcast %143 : vector<1x128xf32> to vector<16x128xf32>
    %145 = arith.addf %141, %144 : vector<16x128xf32>
    %cst_111 = arith.constant 0.000000e+00 : f32
    %146 = vector.broadcast %cst_111 : f32 to vector<16x128xf32>
    %147 = arith.cmpf ogt, %145, %146 : vector<16x128xf32>
    %cst_112 = arith.constant 0.00999999977 : f32
    %148 = vector.broadcast %cst_112 : f32 to vector<16x128xf32>
    %149 = arith.mulf %148, %145 : vector<16x128xf32>
    %150 = arith.select %147, %145, %149 : vector<16x128xi1>, vector<16x128xf32>
    %c2_113 = arith.constant 2 : index
    %c0_114 = arith.constant 0 : index
    %c0_115 = arith.constant 0 : index
    %151 = vector.load %arg12[%c2_113, %c0_114, %c0_115] : memref<5x16x128xf32, #tpu.memory_space<vmem>>, vector<1x16x128xf32>
    %152 = vector.shape_cast %151 : vector<1x16x128xf32> to vector<16x128xf32>
    %153 = vector.shape_cast %150 : vector<16x128xf32> to vector<1x16x128xf32>
    tpu.vector_store %arg12[%c2_113, %c0_114, %c0_115], %153 {strides = array<i32>} : memref<5x16x128xf32, #tpu.memory_space<vmem>>, vector<1x16x128xf32>,
    %c2_116 = arith.constant 2 : index
    %c0_117 = arith.constant 0 : index
    %c0_118 = arith.constant 0 : index
    %154 = vector.load %arg5[%c2_116, %c0_117, %c0_118] : memref<5x16x16xbf16, #tpu.memory_space<vmem>>, vector<1x16x16xbf16>
    %155 = vector.shape_cast %154 : vector<1x16x16xbf16> to vector<16x16xbf16>
    %156 = arith.truncf %150 : vector<16x128xf32> to vector<16x128xbf16>
    %cst_119 = arith.constant dense<0.000000e+00> : vector<16x128xf32>
    %157 = tpu.matmul %155, %156, %cst_119 {dimension_numbers = #tpu.dot_dimension_numbers<[1], [0], [0], [1], [0, 0, 1, 1], [], []>} : vector<16x16xbf16>, vector<16x128xbf16>, vector<16x128xf32> -> vector<16x128xf32>
    %158 = arith.truncf %157 : vector<16x128xf32> to vector<16x128xbf16>
    %c2_120 = arith.constant 2 : index
    %c0_121 = arith.constant 0 : index
    %c0_122 = arith.constant 0 : index
    %159 = vector.load %arg6[%c2_120, %c0_121, %c0_122] : memref<5x128x128xbf16, #tpu.memory_space<vmem>>, vector<1x128x128xbf16>
    %160 = vector.shape_cast %159 : vector<1x128x128xbf16> to vector<128x128xbf16>
    %cst_123 = arith.constant dense<0.000000e+00> : vector<16x128xf32>
    %161 = tpu.matmul %158, %160, %cst_123 {dimension_numbers = #tpu.dot_dimension_numbers<[1], [0], [0], [1], [0, 0, 1, 1], [], []>} : vector<16x128xbf16>, vector<128x128xbf16>, vector<16x128xf32> -> vector<16x128xf32>
    %c2_124 = arith.constant 2 : index
    %c0_125 = arith.constant 0 : index
    %c0_126 = arith.constant 0 : index
    %162 = vector.load %arg7[%c2_124, %c0_125, %c0_126] : memref<5x1x128xf32, #tpu.memory_space<vmem>>, vector<1x1x128xf32>
    %163 = vector.shape_cast %162 : vector<1x1x128xf32> to vector<1x128xf32>
    %164 = vector.broadcast %163 : vector<1x128xf32> to vector<16x128xf32>
    %165 = arith.addf %161, %164 : vector<16x128xf32>
    %cst_127 = arith.constant 0.000000e+00 : f32
    %166 = vector.broadcast %cst_127 : f32 to vector<16x128xf32>
    %167 = arith.cmpf ogt, %165, %166 : vector<16x128xf32>
    %cst_128 = arith.constant 0.00999999977 : f32
    %168 = vector.broadcast %cst_128 : f32 to vector<16x128xf32>
    %169 = arith.mulf %168, %165 : vector<16x128xf32>
    %170 = arith.select %167, %165, %169 : vector<16x128xi1>, vector<16x128xf32>
    %171 = arith.truncf %170 : vector<16x128xf32> to vector<16x128xbf16>
    %c2_129 = arith.constant 2 : index
    %c0_130 = arith.constant 0 : index
    %c0_131 = arith.constant 0 : index
    %172 = vector.load %arg8[%c2_129, %c0_130, %c0_131] : memref<5x128x128xbf16, #tpu.memory_space<vmem>>, vector<1x128x128xbf16>
    %173 = vector.shape_cast %172 : vector<1x128x128xbf16> to vector<128x128xbf16>
    %cst_132 = arith.constant dense<0.000000e+00> : vector<16x128xf32>
    %174 = tpu.matmul %171, %173, %cst_132 {dimension_numbers = #tpu.dot_dimension_numbers<[1], [0], [0], [1], [0, 0, 1, 1], [], []>} : vector<16x128xbf16>, vector<128x128xbf16>, vector<16x128xf32> -> vector<16x128xf32>
    %c2_133 = arith.constant 2 : index
    %c0_134 = arith.constant 0 : index
    %c0_135 = arith.constant 0 : index
    %175 = vector.load %arg9[%c2_133, %c0_134, %c0_135] : memref<5x1x128xf32, #tpu.memory_space<vmem>>, vector<1x1x128xf32>
    %176 = vector.shape_cast %175 : vector<1x1x128xf32> to vector<1x128xf32>
    %177 = vector.broadcast %176 : vector<1x128xf32> to vector<16x128xf32>
    %178 = arith.addf %174, %177 : vector<16x128xf32>
    %cst_136 = arith.constant 0.000000e+00 : f32
    %179 = vector.broadcast %cst_136 : f32 to vector<16x128xf32>
    %180 = arith.cmpf ogt, %178, %179 : vector<16x128xf32>
    %cst_137 = arith.constant 0.00999999977 : f32
    %181 = vector.broadcast %cst_137 : f32 to vector<16x128xf32>
    %182 = arith.mulf %181, %178 : vector<16x128xf32>
    %183 = arith.select %180, %178, %182 : vector<16x128xi1>, vector<16x128xf32>
    %184 = arith.truncf %183 : vector<16x128xf32> to vector<16x128xbf16>
    %c2_138 = arith.constant 2 : index
    %c0_139 = arith.constant 0 : index
    %c0_140 = arith.constant 0 : index
    %185 = vector.load %arg10[%c2_138, %c0_139, %c0_140] : memref<5x128x128xbf16, #tpu.memory_space<vmem>>, vector<1x128x128xbf16>
    %186 = vector.shape_cast %185 : vector<1x128x128xbf16> to vector<128x128xbf16>
    %cst_141 = arith.constant dense<0.000000e+00> : vector<16x128xf32>
    %187 = tpu.matmul %184, %186, %cst_141 {dimension_numbers = #tpu.dot_dimension_numbers<[1], [0], [0], [1], [0, 0, 1, 1], [], []>} : vector<16x128xbf16>, vector<128x128xbf16>, vector<16x128xf32> -> vector<16x128xf32>
    %188 = arith.addf %125, %187 : vector<16x128xf32>
    %c3 = arith.constant 3 : index
    %c0_142 = arith.constant 0 : index
    %c0_143 = arith.constant 0 : index
    %189 = vector.load %arg0[%c3, %c0_142, %c0_143] : memref<5x16x16xbf16, #tpu.memory_space<vmem>>, vector<1x16x16xbf16>
    %190 = vector.shape_cast %189 : vector<1x16x16xbf16> to vector<16x16xbf16>
    %cst_144 = arith.constant dense<0.000000e+00> : vector<16x128xf32>
    %191 = tpu.matmul %190, %0, %cst_144 {dimension_numbers = #tpu.dot_dimension_numbers<[1], [0], [0], [1], [0, 0, 1, 1], [], []>} : vector<16x16xbf16>, vector<16x128xbf16>, vector<16x128xf32> -> vector<16x128xf32>
    %192 = arith.truncf %191 : vector<16x128xf32> to vector<16x128xbf16>
    %c3_145 = arith.constant 3 : index
    %c0_146 = arith.constant 0 : index
    %c0_147 = arith.constant 0 : index
    %193 = vector.load %arg2[%c3_145, %c0_146, %c0_147] : memref<5x128x128xbf16, #tpu.memory_space<vmem>>, vector<1x128x128xbf16>
    %194 = vector.shape_cast %193 : vector<1x128x128xbf16> to vector<128x128xbf16>
    %cst_148 = arith.constant dense<0.000000e+00> : vector<16x128xf32>
    %195 = tpu.matmul %192, %194, %cst_148 {dimension_numbers = #tpu.dot_dimension_numbers<[1], [0], [0], [1], [0, 0, 1, 1], [], []>} : vector<16x128xbf16>, vector<128x128xbf16>, vector<16x128xf32> -> vector<16x128xf32>
    %cst_149 = arith.constant 0.000000e+00 : f32
    %196 = vector.broadcast %cst_149 : f32 to vector<16x128xf32>
    %197 = arith.cmpf ogt, %195, %196 : vector<16x128xf32>
    %cst_150 = arith.constant 0.00999999977 : f32
    %198 = vector.broadcast %cst_150 : f32 to vector<16x128xf32>
    %199 = arith.mulf %198, %195 : vector<16x128xf32>
    %200 = arith.select %197, %195, %199 : vector<16x128xi1>, vector<16x128xf32>
    %201 = arith.truncf %200 : vector<16x128xf32> to vector<16x128xbf16>
    %c3_151 = arith.constant 3 : index
    %c0_152 = arith.constant 0 : index
    %c0_153 = arith.constant 0 : index
    %202 = vector.load %arg3[%c3_151, %c0_152, %c0_153] : memref<5x128x128xbf16, #tpu.memory_space<vmem>>, vector<1x128x128xbf16>
    %203 = vector.shape_cast %202 : vector<1x128x128xbf16> to vector<128x128xbf16>
    %cst_154 = arith.constant dense<0.000000e+00> : vector<16x128xf32>
    %204 = tpu.matmul %201, %203, %cst_154 {dimension_numbers = #tpu.dot_dimension_numbers<[1], [0], [0], [1], [0, 0, 1, 1], [], []>} : vector<16x128xbf16>, vector<128x128xbf16>, vector<16x128xf32> -> vector<16x128xf32>
    %c3_155 = arith.constant 3 : index
    %c0_156 = arith.constant 0 : index
    %c0_157 = arith.constant 0 : index
    %205 = vector.load %arg4[%c3_155, %c0_156, %c0_157] : memref<5x1x128xf32, #tpu.memory_space<vmem>>, vector<1x1x128xf32>
    %206 = vector.shape_cast %205 : vector<1x1x128xf32> to vector<1x128xf32>
    %207 = vector.broadcast %206 : vector<1x128xf32> to vector<16x128xf32>
    %208 = arith.addf %204, %207 : vector<16x128xf32>
    %cst_158 = arith.constant 0.000000e+00 : f32
    %209 = vector.broadcast %cst_158 : f32 to vector<16x128xf32>
    %210 = arith.cmpf ogt, %208, %209 : vector<16x128xf32>
    %cst_159 = arith.constant 0.00999999977 : f32
    %211 = vector.broadcast %cst_159 : f32 to vector<16x128xf32>
    %212 = arith.mulf %211, %208 : vector<16x128xf32>
    %213 = arith.select %210, %208, %212 : vector<16x128xi1>, vector<16x128xf32>
    %c3_160 = arith.constant 3 : index
    %c0_161 = arith.constant 0 : index
    %c0_162 = arith.constant 0 : index
    %214 = vector.load %arg12[%c3_160, %c0_161, %c0_162] : memref<5x16x128xf32, #tpu.memory_space<vmem>>, vector<1x16x128xf32>
    %215 = vector.shape_cast %214 : vector<1x16x128xf32> to vector<16x128xf32>
    %216 = vector.shape_cast %213 : vector<16x128xf32> to vector<1x16x128xf32>
    tpu.vector_store %arg12[%c3_160, %c0_161, %c0_162], %216 {strides = array<i32>} : memref<5x16x128xf32, #tpu.memory_space<vmem>>, vector<1x16x128xf32>,
    %c3_163 = arith.constant 3 : index
    %c0_164 = arith.constant 0 : index
    %c0_165 = arith.constant 0 : index
    %217 = vector.load %arg5[%c3_163, %c0_164, %c0_165] : memref<5x16x16xbf16, #tpu.memory_space<vmem>>, vector<1x16x16xbf16>
    %218 = vector.shape_cast %217 : vector<1x16x16xbf16> to vector<16x16xbf16>
    %219 = arith.truncf %213 : vector<16x128xf32> to vector<16x128xbf16>
    %cst_166 = arith.constant dense<0.000000e+00> : vector<16x128xf32>
    %220 = tpu.matmul %218, %219, %cst_166 {dimension_numbers = #tpu.dot_dimension_numbers<[1], [0], [0], [1], [0, 0, 1, 1], [], []>} : vector<16x16xbf16>, vector<16x128xbf16>, vector<16x128xf32> -> vector<16x128xf32>
    %221 = arith.truncf %220 : vector<16x128xf32> to vector<16x128xbf16>
    %c3_167 = arith.constant 3 : index
    %c0_168 = arith.constant 0 : index
    %c0_169 = arith.constant 0 : index
    %222 = vector.load %arg6[%c3_167, %c0_168, %c0_169] : memref<5x128x128xbf16, #tpu.memory_space<vmem>>, vector<1x128x128xbf16>
    %223 = vector.shape_cast %222 : vector<1x128x128xbf16> to vector<128x128xbf16>
    %cst_170 = arith.constant dense<0.000000e+00> : vector<16x128xf32>
    %224 = tpu.matmul %221, %223, %cst_170 {dimension_numbers = #tpu.dot_dimension_numbers<[1], [0], [0], [1], [0, 0, 1, 1], [], []>} : vector<16x128xbf16>, vector<128x128xbf16>, vector<16x128xf32> -> vector<16x128xf32>
    %c3_171 = arith.constant 3 : index
    %c0_172 = arith.constant 0 : index
    %c0_173 = arith.constant 0 : index
    %225 = vector.load %arg7[%c3_171, %c0_172, %c0_173] : memref<5x1x128xf32, #tpu.memory_space<vmem>>, vector<1x1x128xf32>
    %226 = vector.shape_cast %225 : vector<1x1x128xf32> to vector<1x128xf32>
    %227 = vector.broadcast %226 : vector<1x128xf32> to vector<16x128xf32>
    %228 = arith.addf %224, %227 : vector<16x128xf32>
    %cst_174 = arith.constant 0.000000e+00 : f32
    %229 = vector.broadcast %cst_174 : f32 to vector<16x128xf32>
    %230 = arith.cmpf ogt, %228, %229 : vector<16x128xf32>
    %cst_175 = arith.constant 0.00999999977 : f32
    %231 = vector.broadcast %cst_175 : f32 to vector<16x128xf32>
    %232 = arith.mulf %231, %228 : vector<16x128xf32>
    %233 = arith.select %230, %228, %232 : vector<16x128xi1>, vector<16x128xf32>
    %234 = arith.truncf %233 : vector<16x128xf32> to vector<16x128xbf16>
    %c3_176 = arith.constant 3 : index
    %c0_177 = arith.constant 0 : index
    %c0_178 = arith.constant 0 : index
    %235 = vector.load %arg8[%c3_176, %c0_177, %c0_178] : memref<5x128x128xbf16, #tpu.memory_space<vmem>>, vector<1x128x128xbf16>
    %236 = vector.shape_cast %235 : vector<1x128x128xbf16> to vector<128x128xbf16>
    %cst_179 = arith.constant dense<0.000000e+00> : vector<16x128xf32>
    %237 = tpu.matmul %234, %236, %cst_179 {dimension_numbers = #tpu.dot_dimension_numbers<[1], [0], [0], [1], [0, 0, 1, 1], [], []>} : vector<16x128xbf16>, vector<128x128xbf16>, vector<16x128xf32> -> vector<16x128xf32>
    %c3_180 = arith.constant 3 : index
    %c0_181 = arith.constant 0 : index
    %c0_182 = arith.constant 0 : index
    %238 = vector.load %arg9[%c3_180, %c0_181, %c0_182] : memref<5x1x128xf32, #tpu.memory_space<vmem>>, vector<1x1x128xf32>
    %239 = vector.shape_cast %238 : vector<1x1x128xf32> to vector<1x128xf32>
    %240 = vector.broadcast %239 : vector<1x128xf32> to vector<16x128xf32>
    %241 = arith.addf %237, %240 : vector<16x128xf32>
    %cst_183 = arith.constant 0.000000e+00 : f32
    %242 = vector.broadcast %cst_183 : f32 to vector<16x128xf32>
    %243 = arith.cmpf ogt, %241, %242 : vector<16x128xf32>
    %cst_184 = arith.constant 0.00999999977 : f32
    %244 = vector.broadcast %cst_184 : f32 to vector<16x128xf32>
    %245 = arith.mulf %244, %241 : vector<16x128xf32>
    %246 = arith.select %243, %241, %245 : vector<16x128xi1>, vector<16x128xf32>
    %247 = arith.truncf %246 : vector<16x128xf32> to vector<16x128xbf16>
    %c3_185 = arith.constant 3 : index
    %c0_186 = arith.constant 0 : index
    %c0_187 = arith.constant 0 : index
    %248 = vector.load %arg10[%c3_185, %c0_186, %c0_187] : memref<5x128x128xbf16, #tpu.memory_space<vmem>>, vector<1x128x128xbf16>
    %249 = vector.shape_cast %248 : vector<1x128x128xbf16> to vector<128x128xbf16>
    %cst_188 = arith.constant dense<0.000000e+00> : vector<16x128xf32>
    %250 = tpu.matmul %247, %249, %cst_188 {dimension_numbers = #tpu.dot_dimension_numbers<[1], [0], [0], [1], [0, 0, 1, 1], [], []>} : vector<16x128xbf16>, vector<128x128xbf16>, vector<16x128xf32> -> vector<16x128xf32>
    %251 = arith.addf %188, %250 : vector<16x128xf32>
    %c4 = arith.constant 4 : index
    %c0_189 = arith.constant 0 : index
    %c0_190 = arith.constant 0 : index
    %252 = vector.load %arg0[%c4, %c0_189, %c0_190] : memref<5x16x16xbf16, #tpu.memory_space<vmem>>, vector<1x16x16xbf16>
    %253 = vector.shape_cast %252 : vector<1x16x16xbf16> to vector<16x16xbf16>
    %cst_191 = arith.constant dense<0.000000e+00> : vector<16x128xf32>
    %254 = tpu.matmul %253, %0, %cst_191 {dimension_numbers = #tpu.dot_dimension_numbers<[1], [0], [0], [1], [0, 0, 1, 1], [], []>} : vector<16x16xbf16>, vector<16x128xbf16>, vector<16x128xf32> -> vector<16x128xf32>
    %255 = arith.truncf %254 : vector<16x128xf32> to vector<16x128xbf16>
    %c4_192 = arith.constant 4 : index
    %c0_193 = arith.constant 0 : index
    %c0_194 = arith.constant 0 : index
    %256 = vector.load %arg2[%c4_192, %c0_193, %c0_194] : memref<5x128x128xbf16, #tpu.memory_space<vmem>>, vector<1x128x128xbf16>
    %257 = vector.shape_cast %256 : vector<1x128x128xbf16> to vector<128x128xbf16>
    %cst_195 = arith.constant dense<0.000000e+00> : vector<16x128xf32>
    %258 = tpu.matmul %255, %257, %cst_195 {dimension_numbers = #tpu.dot_dimension_numbers<[1], [0], [0], [1], [0, 0, 1, 1], [], []>} : vector<16x128xbf16>, vector<128x128xbf16>, vector<16x128xf32> -> vector<16x128xf32>
    %cst_196 = arith.constant 0.000000e+00 : f32
    %259 = vector.broadcast %cst_196 : f32 to vector<16x128xf32>
    %260 = arith.cmpf ogt, %258, %259 : vector<16x128xf32>
    %cst_197 = arith.constant 0.00999999977 : f32
    %261 = vector.broadcast %cst_197 : f32 to vector<16x128xf32>
    %262 = arith.mulf %261, %258 : vector<16x128xf32>
    %263 = arith.select %260, %258, %262 : vector<16x128xi1>, vector<16x128xf32>
    %264 = arith.truncf %263 : vector<16x128xf32> to vector<16x128xbf16>
    %c4_198 = arith.constant 4 : index
    %c0_199 = arith.constant 0 : index
    %c0_200 = arith.constant 0 : index
    %265 = vector.load %arg3[%c4_198, %c0_199, %c0_200] : memref<5x128x128xbf16, #tpu.memory_space<vmem>>, vector<1x128x128xbf16>
    %266 = vector.shape_cast %265 : vector<1x128x128xbf16> to vector<128x128xbf16>
    %cst_201 = arith.constant dense<0.000000e+00> : vector<16x128xf32>
    %267 = tpu.matmul %264, %266, %cst_201 {dimension_numbers = #tpu.dot_dimension_numbers<[1], [0], [0], [1], [0, 0, 1, 1], [], []>} : vector<16x128xbf16>, vector<128x128xbf16>, vector<16x128xf32> -> vector<16x128xf32>
    %c4_202 = arith.constant 4 : index
    %c0_203 = arith.constant 0 : index
    %c0_204 = arith.constant 0 : index
    %268 = vector.load %arg4[%c4_202, %c0_203, %c0_204] : memref<5x1x128xf32, #tpu.memory_space<vmem>>, vector<1x1x128xf32>
    %269 = vector.shape_cast %268 : vector<1x1x128xf32> to vector<1x128xf32>
    %270 = vector.broadcast %269 : vector<1x128xf32> to vector<16x128xf32>
    %271 = arith.addf %267, %270 : vector<16x128xf32>
    %cst_205 = arith.constant 0.000000e+00 : f32
    %272 = vector.broadcast %cst_205 : f32 to vector<16x128xf32>
    %273 = arith.cmpf ogt, %271, %272 : vector<16x128xf32>
    %cst_206 = arith.constant 0.00999999977 : f32
    %274 = vector.broadcast %cst_206 : f32 to vector<16x128xf32>
    %275 = arith.mulf %274, %271 : vector<16x128xf32>
    %276 = arith.select %273, %271, %275 : vector<16x128xi1>, vector<16x128xf32>
    %c4_207 = arith.constant 4 : index
    %c0_208 = arith.constant 0 : index
    %c0_209 = arith.constant 0 : index
    %277 = vector.load %arg12[%c4_207, %c0_208, %c0_209] : memref<5x16x128xf32, #tpu.memory_space<vmem>>, vector<1x16x128xf32>
    %278 = vector.shape_cast %277 : vector<1x16x128xf32> to vector<16x128xf32>
    %279 = vector.shape_cast %276 : vector<16x128xf32> to vector<1x16x128xf32>
    tpu.vector_store %arg12[%c4_207, %c0_208, %c0_209], %279 {strides = array<i32>} : memref<5x16x128xf32, #tpu.memory_space<vmem>>, vector<1x16x128xf32>,
    %c4_210 = arith.constant 4 : index
    %c0_211 = arith.constant 0 : index
    %c0_212 = arith.constant 0 : index
    %280 = vector.load %arg5[%c4_210, %c0_211, %c0_212] : memref<5x16x16xbf16, #tpu.memory_space<vmem>>, vector<1x16x16xbf16>
    %281 = vector.shape_cast %280 : vector<1x16x16xbf16> to vector<16x16xbf16>
    %282 = arith.truncf %276 : vector<16x128xf32> to vector<16x128xbf16>
    %cst_213 = arith.constant dense<0.000000e+00> : vector<16x128xf32>
    %283 = tpu.matmul %281, %282, %cst_213 {dimension_numbers = #tpu.dot_dimension_numbers<[1], [0], [0], [1], [0, 0, 1, 1], [], []>} : vector<16x16xbf16>, vector<16x128xbf16>, vector<16x128xf32> -> vector<16x128xf32>
    %284 = arith.truncf %283 : vector<16x128xf32> to vector<16x128xbf16>
    %c4_214 = arith.constant 4 : index
    %c0_215 = arith.constant 0 : index
    %c0_216 = arith.constant 0 : index
    %285 = vector.load %arg6[%c4_214, %c0_215, %c0_216] : memref<5x128x128xbf16, #tpu.memory_space<vmem>>, vector<1x128x128xbf16>
    %286 = vector.shape_cast %285 : vector<1x128x128xbf16> to vector<128x128xbf16>
    %cst_217 = arith.constant dense<0.000000e+00> : vector<16x128xf32>
    %287 = tpu.matmul %284, %286, %cst_217 {dimension_numbers = #tpu.dot_dimension_numbers<[1], [0], [0], [1], [0, 0, 1, 1], [], []>} : vector<16x128xbf16>, vector<128x128xbf16>, vector<16x128xf32> -> vector<16x128xf32>
    %c4_218 = arith.constant 4 : index
    %c0_219 = arith.constant 0 : index
    %c0_220 = arith.constant 0 : index
    %288 = vector.load %arg7[%c4_218, %c0_219, %c0_220] : memref<5x1x128xf32, #tpu.memory_space<vmem>>, vector<1x1x128xf32>
    %289 = vector.shape_cast %288 : vector<1x1x128xf32> to vector<1x128xf32>
    %290 = vector.broadcast %289 : vector<1x128xf32> to vector<16x128xf32>
    %291 = arith.addf %287, %290 : vector<16x128xf32>
    %cst_221 = arith.constant 0.000000e+00 : f32
    %292 = vector.broadcast %cst_221 : f32 to vector<16x128xf32>
    %293 = arith.cmpf ogt, %291, %292 : vector<16x128xf32>
    %cst_222 = arith.constant 0.00999999977 : f32
    %294 = vector.broadcast %cst_222 : f32 to vector<16x128xf32>
    %295 = arith.mulf %294, %291 : vector<16x128xf32>
    %296 = arith.select %293, %291, %295 : vector<16x128xi1>, vector<16x128xf32>
    %297 = arith.truncf %296 : vector<16x128xf32> to vector<16x128xbf16>
    %c4_223 = arith.constant 4 : index
    %c0_224 = arith.constant 0 : index
    %c0_225 = arith.constant 0 : index
    %298 = vector.load %arg8[%c4_223, %c0_224, %c0_225] : memref<5x128x128xbf16, #tpu.memory_space<vmem>>, vector<1x128x128xbf16>
    %299 = vector.shape_cast %298 : vector<1x128x128xbf16> to vector<128x128xbf16>
    %cst_226 = arith.constant dense<0.000000e+00> : vector<16x128xf32>
    %300 = tpu.matmul %297, %299, %cst_226 {dimension_numbers = #tpu.dot_dimension_numbers<[1], [0], [0], [1], [0, 0, 1, 1], [], []>} : vector<16x128xbf16>, vector<128x128xbf16>, vector<16x128xf32> -> vector<16x128xf32>
    %c4_227 = arith.constant 4 : index
    %c0_228 = arith.constant 0 : index
    %c0_229 = arith.constant 0 : index
    %301 = vector.load %arg9[%c4_227, %c0_228, %c0_229] : memref<5x1x128xf32, #tpu.memory_space<vmem>>, vector<1x1x128xf32>
    %302 = vector.shape_cast %301 : vector<1x1x128xf32> to vector<1x128xf32>
    %303 = vector.broadcast %302 : vector<1x128xf32> to vector<16x128xf32>
    %304 = arith.addf %300, %303 : vector<16x128xf32>
    %cst_230 = arith.constant 0.000000e+00 : f32
    %305 = vector.broadcast %cst_230 : f32 to vector<16x128xf32>
    %306 = arith.cmpf ogt, %304, %305 : vector<16x128xf32>
    %cst_231 = arith.constant 0.00999999977 : f32
    %307 = vector.broadcast %cst_231 : f32 to vector<16x128xf32>
    %308 = arith.mulf %307, %304 : vector<16x128xf32>
    %309 = arith.select %306, %304, %308 : vector<16x128xi1>, vector<16x128xf32>
    %310 = arith.truncf %309 : vector<16x128xf32> to vector<16x128xbf16>
    %c4_232 = arith.constant 4 : index
    %c0_233 = arith.constant 0 : index
    %c0_234 = arith.constant 0 : index
    %311 = vector.load %arg10[%c4_232, %c0_233, %c0_234] : memref<5x128x128xbf16, #tpu.memory_space<vmem>>, vector<1x128x128xbf16>
    %312 = vector.shape_cast %311 : vector<1x128x128xbf16> to vector<128x128xbf16>
    %cst_235 = arith.constant dense<0.000000e+00> : vector<16x128xf32>
    %313 = tpu.matmul %310, %312, %cst_235 {dimension_numbers = #tpu.dot_dimension_numbers<[1], [0], [0], [1], [0, 0, 1, 1], [], []>} : vector<16x128xbf16>, vector<128x128xbf16>, vector<16x128xf32> -> vector<16x128xf32>
    %314 = arith.addf %251, %313 : vector<16x128xf32>
    %c0_236 = arith.constant 0 : index
    %c0_237 = arith.constant 0 : index
    %315 = vector.load %arg11[%c0_236, %c0_237] : memref<1x128xf32, #tpu.memory_space<vmem>>, vector<1x128xf32>
    %316 = vector.broadcast %315 : vector<1x128xf32> to vector<16x128xf32>
    %317 = arith.addf %314, %316 : vector<16x128xf32>
    %cst_238 = arith.constant 0.000000e+00 : f32
    %318 = vector.broadcast %cst_238 : f32 to vector<16x128xf32>
    %319 = arith.cmpf ogt, %317, %318 : vector<16x128xf32>
    %cst_239 = arith.constant 0.00999999977 : f32
    %320 = vector.broadcast %cst_239 : f32 to vector<16x128xf32>
    %321 = arith.mulf %320, %317 : vector<16x128xf32>
    %322 = arith.select %319, %317, %321 : vector<16x128xi1>, vector<16x128xf32>
    %c0_240 = arith.constant 0 : index
    %c0_241 = arith.constant 0 : index
    %323 = vector.load %arg13[%c0_240, %c0_241] : memref<16x128xf32, #tpu.memory_space<vmem>>, vector<16x128xf32>
    tpu.vector_store %arg13[%c0_240, %c0_241], %322 {strides = array<i32>} : memref<16x128xf32, #tpu.memory_space<vmem>>, vector<16x128xf32>,
    return
  }
}

</mosaic_0001>

<bundles_post_ra>
// kernel: gcn_forward_pallas.1
= control target key start
LH: loop header
LB: loop body
LE: loop exit
PB: predicated region body
PF: predicated region fallthrough
CT: control target
= control target key end

     0   :  { %v5181_v1 = vmov 0.0   ;;  %vm5182_vm0 = vmmov 0   ;;  %vm60_vm1 = vcmask 130048   ;;  %s6307_s0 = inlined_call_operand.vmem [shape: bf16[5,16,16], index: 0, kind: input, shape index: {}]   ;;  %s6308_s1 = inlined_call_operand.vmem [shape: bf16[16,128], index: 1, kind: input, shape index: {}]   ;;  %s6309_s2 = inlined_call_operand.vmem [shape: bf16[5,128,128], index: 2, kind: input, shape index: {}]   ;;  %s6310_s3 = inlined_call_operand.vmem [shape: bf16[5,128,128], index: 3, kind: input, shape index: {}]   ;;  %s6311_s4 = inlined_call_operand.vmem [shape: f32[5,1,128], index: 4, kind: input, shape index: {}]   ;;  %s6312_s5 = inlined_call_operand.vmem [shape: bf16[5,16,16], index: 5, kind: input, shape index: {}]   ;;  %s6313_s6 = inlined_call_operand.vmem [shape: bf16[5,128,128], index: 6, kind: input, shape index: {}]   ;;  %s6314_s7 = inlined_call_operand.vmem [shape: f32[5,1,128], index: 7, kind: input, shape index: {}]   ;;  %s6315_s8 = inlined_call_operand.vmem [shape: bf16[5,128,128], index: 8, kind: input, shape index: {}]   ;;  %s6316_s9 = inlined_call_operand.vmem [shape: f32[5,1,128], index: 9, kind: input, shape index: {}]   ;;  %s6317_s10 = inlined_call_operand.vmem [shape: bf16[5,128,128], index: 10, kind: input, shape index: {}]   ;;  %s6318_s11 = inlined_call_operand.vmem [shape: f32[1,128], index: 11, kind: input, shape index: {}]   ;;  %s6319_s12 = inlined_call_operand.vmem [shape: f32[5,16,128], index: 12, kind: output, shape index: {0}]   ;;  %s6320_s13 = inlined_call_operand.hbm [shape: f32[16,128], index: 13, kind: output, shape index: {1}]  }
   0x1   :  { %v4944_v0 = vld [vmem:[%s6308_s1] sm:$0xff]   ;;  %4379 = vmatprep.subr.bf16.mxu1 %v5181_v1  ;;  %4405 = vmatprep.subr.bf16.mxu0 %v5181_v1  ;;  %v4947_v4 = vld [vmem:[%s6309_s2 + $0x8] sm:$0xff]   ;;  %v4948_v5 = vld [vmem:[%s6309_s2 + $0x10] sm:$0xff]  }
   0x2   :  { %v4945_v2 = vld [vmem:[%s6307_s0] sm:$0xff]   ;;  %4380 = vmatpush3.bf16.msra.mxu1 %v4944_v0  ;;  %4381 = vmatprep.mubr.msk.bf16.mxu1 %vm5182_vm0, %v5181_v1  ;;  %v4949_v6 = vld [vmem:[%s6309_s2 + $0x18] sm:$0xff]   ;;  %v4951_v8 = vld [vmem:[%s6309_s2 + $0x28] sm:$0xff]  }
   0x3   :  { %v4946_v3 = vld [vmem:[%s6309_s2] sm:$0xff]   ;;  %4385 = vmatprep.subr.bf16.mxu1 %v5181_v1  ;;  %4421 = vmatprep.mubr.msk.bf16.mxu0 %vm5182_vm0, %v5181_v1  ;;  %v4952_v9 = vld [vmem:[%s6309_s2 + $0x30] sm:$0xff]   ;;  %v4953_v10 = vld [vmem:[%s6309_s2 + $0x38] sm:$0xff]  }
   0x4   :  { %v4950_v7 = vld [vmem:[%s6309_s2 + $0x20] sm:$0xff]   ;;  %v4955_v12 = vld [vmem:[%s6310_s3 + $0x8] sm:$0xff]   ;;  %v4956_v13 = vld [vmem:[%s6310_s3 + $0x10] sm:$0xff]  }
   0x5   :  { %4382 = vmatmul.mubr.msk.bf16.vlgmr.msra.gmra.mrb[0].mxu1 %vm60_vm1, %v4945_v2  ;;  %v4954_v11 = vld [vmem:[%s6310_s3] sm:$0xff]   ;;  %v4957_v14 = vld [vmem:[%s6310_s3 + $0x18] sm:$0xff]   ;;  %v4959_v16 = vld [vmem:[%s6310_s3 + $0x28] sm:$0xff]  }
   0x6   :  { %4386 = vmatpush3.bf16.msra.mxu1 %v4946_v3  ;;  %4401 = vmatprep.mubr.msk.bf16.mxu1 %vm5182_vm0, %v5181_v1  ;;  %v4958_v15 = vld [vmem:[%s6310_s3 + $0x20] sm:$0xff]  }
   0x7   :  { %4387 = vmatprep.subr.bf16.mxu1 %v5181_v1  ;;  %4406 = vmatpush3.bf16.msra.mxu0 %v4954_v11 }
   0x8   :  { %4407 = vmatprep.subr.bf16.mxu0 %v5181_v1 }
   0xa   :  { %4388 = vmatpush3.bf16.msra.mxu1 %v4947_v4 }
   0xb   :  { %4389 = vmatprep.subr.bf16.mxu1 %v5181_v1  ;;  %4408 = vmatpush3.bf16.msra.mxu0 %v4955_v12 }
   0xc   :  { %4409 = vmatprep.subr.bf16.mxu0 %v5181_v1 }
   0xe   :  { %4390 = vmatpush3.bf16.msra.mxu1 %v4948_v5 }
   0xf   :  { %4391 = vmatprep.subr.bf16.mxu1 %v5181_v1  ;;  %4410 = vmatpush3.bf16.msra.mxu0 %v4956_v13 }
  0x10   :  { %4411 = vmatprep.subr.bf16.mxu0 %v5181_v1 }
  0x12   :  { %4392 = vmatpush3.bf16.msra.mxu1 %v4949_v6 }
  0x13   :  { %4393 = vmatprep.subr.bf16.mxu1 %v5181_v1  ;;  %4412 = vmatpush3.bf16.msra.mxu0 %v4957_v14 }
  0x14   :  { %4413 = vmatprep.subr.bf16.mxu0 %v5181_v1 }
  0x16   :  { %4394 = vmatpush3.bf16.msra.mxu1 %v4950_v7 }
  0x17   :  { %4395 = vmatprep.subr.bf16.mxu1 %v5181_v1  ;;  %4414 = vmatpush3.bf16.msra.mxu0 %v4958_v15 }
  0x18   :  { %4415 = vmatprep.subr.bf16.mxu0 %v5181_v1 }
  0x1a   :  { %4396 = vmatpush3.bf16.msra.mxu1 %v4951_v8 }
  0x1b   :  { %4397 = vmatprep.subr.bf16.mxu1 %v5181_v1  ;;  %4416 = vmatpush3.bf16.msra.mxu0 %v4959_v16 }
  0x1c   :  { %4417 = vmatprep.subr.bf16.mxu0 %v5181_v1 }
  0x1e   :  { %4398 = vmatpush3.bf16.msra.mxu1 %v4952_v9 }
  0x1f   :  { %4399 = vmatprep.subr.bf16.mxu1 %v5181_v1 }
  0x22   :  { %4400 = vmatpush3.bf16.msra.mxu1 %v4953_v10 }
  0x23   :  { %4425 = vmatprep.subr.bf16.mxu1 %v5181_v1 }
  0x24   :  { %19 = vsyncpa [#allocation3], 0  ;;  %v4960_v22 = vld [vmem:[%s6310_s3 + $0x30] sm:$0xff]   ;;  %v4961_v23 = vld [vmem:[%s6310_s3 + $0x38] sm:$0xff]  }
  0x25   :  { %4418 = vmatpush3.bf16.msra.mxu0 %v4960_v22  ;;  %v4963_v33 = vld [vmem:[%s6313_s6] sm:$0xff]   ;;  %v4964_v34 = vld [vmem:[%s6313_s6 + $0x8] sm:$0xff]   ;;  %v4965_v35 = vld [vmem:[%s6313_s6 + $0x10] sm:$0xff]  }
  0x26   :  { %4419 = vmatprep.subr.bf16.mxu0 %v5181_v1  ;;  %v4966_v36 = vld [vmem:[%s6313_s6 + $0x18] sm:$0xff]   ;;  %v4967_v37 = vld [vmem:[%s6313_s6 + $0x20] sm:$0xff]   ;;  %v4968_v38 = vld [vmem:[%s6313_s6 + $0x28] sm:$0xff]  }
  0x27   :  { %v4969_v39 = vld [vmem:[%s6313_s6 + $0x30] sm:$0xff]   ;;  %v3552_v40 = vld [vmem:[%s6311_s4] ss:$0 sm:$0xff]  ;;  %v4970_v53 = vld [vmem:[%s6313_s6 + $0x38] sm:$0xff]  }
  0x28   :  { %v4962_v52 = vld [vmem:[%s6312_s5] sm:$0xff]   ;;  %v4972_v55 = vld [vmem:[%s6315_s8 + $0x8] sm:$0xff]   ;;  %v4973_v56 = vld [vmem:[%s6315_s8 + $0x10] sm:$0xff]  }
  0x29   :  { %4420 = vmatpush3.bf16.msra.mxu0 %v4961_v23  ;;  %v4971_v54 = vld [vmem:[%s6315_s8] sm:$0xff]   ;;  %v4974_v57 = vld [vmem:[%s6315_s8 + $0x18] sm:$0xff]   ;;  %v4976_v59 = vld [vmem:[%s6315_s8 + $0x28] sm:$0xff]  }
  0x2a   :  { %4431 = vmatprep.subr.bf16.mxu0 %v5181_v1  ;;  %v4975_v58 = vld [vmem:[%s6315_s8 + $0x20] sm:$0xff]   ;;  %v4977_v2 = vld [vmem:[%s6315_s8 + $0x30] sm:$0xff]   ;;  %v4978_v3 = vld [vmem:[%s6315_s8 + $0x38] sm:$0xff]  }
  0x2b   :  { %v3563_v4 = vld [vmem:[%s6314_s7] ss:$0 sm:$0xff]  ;;  %v4985_v23 = vld [vmem:[%s6309_s2 + $0x68] sm:$0xff]  }
  0x2c   :  { %v5428_v16 = vld [vmem:[%s6308_s1] sm:$0xff]  }
  0x2d   :  { %v4984_v22 = vld [vmem:[%s6309_s2 + $0x60] sm:$0xff]  }
  0xd8   :  { %v98_v17 = vpop.f32.mrb[0].mxu1 }
  0xd9   :  { %v4383_v18 = vpop.f32.mrb[1].mxu1 }
  0xda   :  { %v101_v19 = vpop.f32.mrb[2].mxu1  ;;  %v4980_v18 = vld [vmem:[%s6309_s2 + $0x40] sm:$0xff]  }
  0xdb   :  { %v105_v20 = vpack.c.bf16 %v101_v19, %v98_v17  ;;  %v4384_v21 = vpop.f32.mrb[3].mxu1  ;;  %v4979_v17 = vld [vmem:[%s6307_s0 + $0x8] sm:$0xff]  }
  0xdc   :  { %v4981_v19 = vld [vmem:[%s6309_s2 + $0x48] sm:$0xff]   ;;  %v4983_v21 = vld [vmem:[%s6309_s2 + $0x58] sm:$0xff]  }
  0xdd   :  { %4402 = vmatmul.mubr.bf16.vlgmr.msra.gmra.mrb[4].mxu1 %v105_v20  ;;  %v4982_v20 = vld [vmem:[%s6309_s2 + $0x50] sm:$0xff]  }
  0xde   :  { %4427 = vmatprep.mubr.msk.bf16.mxu1 %vm5182_vm0, %v5181_v1 }
 0x1b0   :  { %v204_v24 = vpop.f32.mrb[4].mxu1 }
 0x1b1   :  { %v213_v25 = vmul.f32 0.01, %v204_v24  ;;  %v4403_v26 = vpop.f32.mrb[5].mxu1  ;;  %vm211_vm2 = vcmp.gt.f32.partialorder %v204_v24, 0.0 }
 0x1b2   :  { %v207_v27 = vpop.f32.mrb[6].mxu1  ;;  %v4988_v26 = vld [vmem:[%s6310_s3 + $0x40] sm:$0xff]  }
 0x1b3   :  { %vm212_vm3 = vcmp.gt.f32.partialorder %v207_v27, 0.0  ;;  %v214_v28 = vmul.f32 0.01, %v207_v27  ;;  %v4404_v29 = vpop.f32.mrb[7].mxu1  ;;  %v215_v30 = vsel %vm211_vm2, %v204_v24, %v213_v25  ;;  %v4986_v24 = vld [vmem:[%s6309_s2 + $0x70] sm:$0xff]   ;;  %v4987_v25 = vld [vmem:[%s6309_s2 + $0x78] sm:$0xff]  }
 0x1b4   :  { %v4991_v29 = vld [vmem:[%s6310_s3 + $0x58] sm:$0xff]  }
 0x1b5   :  { %v216_v31 = vsel %vm212_vm3, %v207_v27, %v214_v28  ;;  %v4989_v27 = vld [vmem:[%s6310_s3 + $0x48] sm:$0xff]   ;;  %v4990_v28 = vld [vmem:[%s6310_s3 + $0x50] sm:$0xff]  }
 0x1b6   :  { %v217_v32 = vpack.c.bf16 %v216_v31, %v215_v30  ;;  %v4992_v30 = vld [vmem:[%s6310_s3 + $0x60] sm:$0xff]   ;;  %v4993_v31 = vld [vmem:[%s6310_s3 + $0x68] sm:$0xff]  }
 0x1b8   :  { %4422 = vmatmul.mubr.bf16.vlgmr.msra.gmra.mrb[0].mxu0 %v217_v32  ;;  %v3572_v32 = vld [vmem:[%s6316_s9] ss:$0 sm:$0xff] }
 0x1b9   :  { %4447 = vmatprep.mubr.msk.bf16.mxu0 %vm5182_vm0, %v5181_v1  ;;  %4432 = vmatpush3.bf16.msra.mxu0 %v4963_v33 }
 0x1ba   :  { %4433 = vmatprep.subr.bf16.mxu0 %v5181_v1 }
 0x1bd   :  { %4434 = vmatpush3.bf16.msra.mxu0 %v4964_v34 }
 0x1be   :  { %4435 = vmatprep.subr.bf16.mxu0 %v5181_v1 }
 0x1c1   :  { %4436 = vmatpush3.bf16.msra.mxu0 %v4965_v35 }
 0x1c2   :  { %4437 = vmatprep.subr.bf16.mxu0 %v5181_v1 }
 0x1c5   :  { %4438 = vmatpush3.bf16.msra.mxu0 %v4966_v36 }
 0x1c6   :  { %4439 = vmatprep.subr.bf16.mxu0 %v5181_v1 }
 0x1c9   :  { %4440 = vmatpush3.bf16.msra.mxu0 %v4967_v37 }
 0x1ca   :  { %4441 = vmatprep.subr.bf16.mxu0 %v5181_v1 }
 0x1cd   :  { %4442 = vmatpush3.bf16.msra.mxu0 %v4968_v38 }
 0x1ce   :  { %4443 = vmatprep.subr.bf16.mxu0 %v5181_v1 }
 0x1d1   :  { %4444 = vmatpush3.bf16.msra.mxu0 %v4969_v39 }
 0x1d2   :  { %4445 = vmatprep.subr.bf16.mxu0 %v5181_v1 }
 0x1d5   :  { %4446 = vmatpush3.bf16.msra.mxu0 %v4970_v53 }
 0x1d6   :  { %4497 = vmatprep.subr.bf16.mxu0 %v5181_v1 }
 0x28b   :  { %v323_v41 = vpop.f32.mrb[0].mxu0 }
 0x28c   :  { %v324_v42 = vadd.f32 %v3552_v40, %v323_v41  ;;  %v4423_v43 = vpop.f32.mrb[1].mxu0 }
 0x28d   :  { %v326_v44 = vpop.f32.mrb[2].mxu0 }
 0x28e   :  { %vm330_vm4 = vcmp.gt.f32.partialorder %v324_v42, 0.0  ;;  %v332_v45 = vmul.f32 0.01, %v324_v42  ;;  %v327_v46 = vadd.f32 %v3552_v40, %v326_v44  ;;  %v4424_v47 = vpop.f32.mrb[3].mxu0 }
 0x290   :  { %v334_v48 = vsel %vm330_vm4, %v324_v42, %v332_v45  ;;  %vm331_vm5 = vcmp.gt.f32.partialorder %v327_v46, 0.0  ;;  %v333_v49 = vmul.f32 0.01, %v327_v46 }
 0x291   :  { %336 = vst [vmem:[%s6319_s12] sm:$0xff] %v334_v48 }
 0x292   :  { %v335_v50 = vsel %vm331_vm5, %v327_v46, %v333_v49  ;;  %v4994_v49 = vld [vmem:[%s6310_s3 + $0x70] sm:$0xff]  }
 0x293   :  { %337 = vst [vmem:[%s6319_s12 + $0x8] sm:$0xff] %v335_v50  ;;  %v340_v51 = vpack.c.bf16 %v335_v50, %v334_v48  ;;  %v4995_v50 = vld [vmem:[%s6310_s3 + $0x78] sm:$0xff]  }
 0x295   :  { %4426 = vmatpush3.bf16.msra.mxu1 %v340_v51 }
 0x296   :  { %4451 = vmatprep.subr.bf16.mxu1 %v5181_v1 }
 0x298   :  { %4428 = vmatmul.mubr.msk.bf16.vlgmr.msra.gmra.mrb[8].mxu1 %vm60_vm1, %v4962_v52 }
 0x299   :  { %4467 = vmatprep.mubr.msk.bf16.mxu1 %vm5182_vm0, %v5181_v1  ;;  %4452 = vmatpush3.bf16.msra.mxu1 %v4971_v54 }
 0x29a   :  { %4453 = vmatprep.subr.bf16.mxu1 %v5181_v1 }
 0x29d   :  { %4454 = vmatpush3.bf16.msra.mxu1 %v4972_v55 }
 0x29e   :  { %4455 = vmatprep.subr.bf16.mxu1 %v5181_v1 }
 0x2a1   :  { %4456 = vmatpush3.bf16.msra.mxu1 %v4973_v56 }
 0x2a2   :  { %4457 = vmatprep.subr.bf16.mxu1 %v5181_v1 }
 0x2a5   :  { %4458 = vmatpush3.bf16.msra.mxu1 %v4974_v57 }
 0x2a6   :  { %4459 = vmatprep.subr.bf16.mxu1 %v5181_v1 }
 0x2a9   :  { %4460 = vmatpush3.bf16.msra.mxu1 %v4975_v58 }
 0x2aa   :  { %4461 = vmatprep.subr.bf16.mxu1 %v5181_v1 }
 0x2ad   :  { %4462 = vmatpush3.bf16.msra.mxu1 %v4976_v59 }
 0x2ae   :  { %4463 = vmatprep.subr.bf16.mxu1 %v5181_v1 }
 0x2b1   :  { %4464 = vmatpush3.bf16.msra.mxu1 %v4977_v2  ;;  %v5002_v2 = vld [vmem:[%s6313_s6 + $0x68] sm:$0xff]  }
 0x2b2   :  { %4465 = vmatprep.subr.bf16.mxu1 %v5181_v1 }
 0x2b5   :  { %4466 = vmatpush3.bf16.msra.mxu1 %v4978_v3  ;;  %v5003_v3 = vld [vmem:[%s6313_s6 + $0x70] sm:$0xff]  }
 0x2b6   :  { %4471 = vmatprep.subr.bf16.mxu1 %v5181_v1 }
 0x36b   :  { %v383_v60 = vpop.f32.mrb[8].mxu1 }
 0x36c   :  { %v4429_v61 = vpop.f32.mrb[9].mxu1 }
 0x36d   :  { %v386_v62 = vpop.f32.mrb[10].mxu1  ;;  %v4998_v61 = vld [vmem:[%s6313_s6 + $0x48] sm:$0xff]  }
 0x36e   :  { %v390_v63 = vpack.c.bf16 %v386_v62, %v383_v60  ;;  %v4430_v0 = vpop.f32.mrb[11].mxu1  ;;  %v4997_v60 = vld [vmem:[%s6313_s6 + $0x40] sm:$0xff]   ;;  %v4999_v62 = vld [vmem:[%s6313_s6 + $0x50] sm:$0xff]  }
 0x36f   :  { %v5001_v0 = vld [vmem:[%s6313_s6 + $0x60] sm:$0xff]  }
 0x370   :  { %4448 = vmatmul.mubr.bf16.vlgmr.msra.gmra.mrb[4].mxu0 %v390_v63  ;;  %v5000_v63 = vld [vmem:[%s6313_s6 + $0x58] sm:$0xff]  }
 0x371   :  { %4513 = vmatprep.mubr.msk.bf16.mxu0 %vm5182_vm0, %v5181_v1  ;;  %4498 = vmatpush3.bf16.msra.mxu0 %v4988_v26 }
 0x372   :  { %4499 = vmatprep.subr.bf16.mxu0 %v5181_v1 }
 0x375   :  { %4500 = vmatpush3.bf16.msra.mxu0 %v4989_v27 }
 0x376   :  { %4501 = vmatprep.subr.bf16.mxu0 %v5181_v1 }
 0x379   :  { %4502 = vmatpush3.bf16.msra.mxu0 %v4990_v28 }
 0x37a   :  { %4503 = vmatprep.subr.bf16.mxu0 %v5181_v1 }
 0x37d   :  { %4504 = vmatpush3.bf16.msra.mxu0 %v4991_v29 }
 0x37e   :  { %4505 = vmatprep.subr.bf16.mxu0 %v5181_v1 }
 0x381   :  { %4506 = vmatpush3.bf16.msra.mxu0 %v4992_v30  ;;  %v5011_v30 = vld [vmem:[%s6315_s8 + $0x70] sm:$0xff]  }
 0x382   :  { %4507 = vmatprep.subr.bf16.mxu0 %v5181_v1 }
 0x385   :  { %4508 = vmatpush3.bf16.msra.mxu0 %v4993_v31  ;;  %v5012_v31 = vld [vmem:[%s6315_s8 + $0x78] sm:$0xff]  }
 0x386   :  { %4509 = vmatprep.subr.bf16.mxu0 %v5181_v1 }
 0x389   :  { %4510 = vmatpush3.bf16.msra.mxu0 %v4994_v49 }
 0x38a   :  { %4511 = vmatprep.subr.bf16.mxu0 %v5181_v1 }
 0x38d   :  { %4512 = vmatpush3.bf16.msra.mxu0 %v4995_v50 }
 0x38e   :  { %4523 = vmatprep.subr.bf16.mxu0 %v5181_v1 }
 0x443   :  { %v496_v5 = vpop.f32.mrb[4].mxu0 }
 0x444   :  { %v497_v6 = vadd.f32 %v3563_v4, %v496_v5  ;;  %v4449_v7 = vpop.f32.mrb[5].mxu0 }
 0x445   :  { %v499_v8 = vpop.f32.mrb[6].mxu0 }
 0x446   :  { %v505_v9 = vmul.f32 0.01, %v497_v6  ;;  %v500_v10 = vadd.f32 %v3563_v4, %v499_v8  ;;  %v4450_v11 = vpop.f32.mrb[7].mxu0  ;;  %vm503_vm6 = vcmp.gt.f32.partialorder %v497_v6, 0.0  ;;  %v3626_v4 = vld [vmem:[%s6311_s4 + $0x1] ss:$0 sm:$0xff] }
 0x448   :  { %vm504_vm7 = vcmp.gt.f32.partialorder %v500_v10, 0.0  ;;  %v506_v12 = vmul.f32 0.01, %v500_v10  ;;  %v507_v13 = vsel %vm503_vm6, %v497_v6, %v505_v9 }
 0x44a   :  { %v508_v14 = vsel %vm504_vm7, %v500_v10, %v506_v12 }
 0x44b   :  { %v509_v15 = vpack.c.bf16 %v508_v14, %v507_v13 }
 0x44d   :  { %4468 = vmatmul.mubr.bf16.vlgmr.msra.gmra.mrb[12].mxu1 %v509_v15 }
 0x44e   :  { %4472 = vmatpush3.bf16.msra.mxu1 %v5428_v16  ;;  %4473 = vmatprep.mubr.msk.bf16.mxu1 %vm5182_vm0, %v5181_v1 }
 0x44f   :  { %4477 = vmatprep.subr.bf16.mxu1 %v5181_v1 }
 0x455   :  { %4474 = vmatmul.mubr.msk.bf16.vlgmr.msra.gmra.mrb[16].mxu1 %vm60_vm1, %v4979_v17  ;;  %v4996_v17 = vld [vmem:[%s6312_s5 + $0x8] sm:$0xff]  }
 0x456   :  { %4478 = vmatpush3.bf16.msra.mxu1 %v4980_v18  ;;  %4493 = vmatprep.mubr.msk.bf16.mxu1 %vm5182_vm0, %v5181_v1  ;;  %v5004_v18 = vld [vmem:[%s6313_s6 + $0x78] sm:$0xff]  }
 0x457   :  { %4479 = vmatprep.subr.bf16.mxu1 %v5181_v1 }
 0x45a   :  { %4480 = vmatpush3.bf16.msra.mxu1 %v4981_v19  ;;  %v5005_v19 = vld [vmem:[%s6315_s8 + $0x40] sm:$0xff]  }
 0x45b   :  { %4481 = vmatprep.subr.bf16.mxu1 %v5181_v1 }
 0x45e   :  { %4482 = vmatpush3.bf16.msra.mxu1 %v4982_v20  ;;  %v5006_v20 = vld [vmem:[%s6315_s8 + $0x48] sm:$0xff]  }
 0x45f   :  { %4483 = vmatprep.subr.bf16.mxu1 %v5181_v1 }
 0x462   :  { %4484 = vmatpush3.bf16.msra.mxu1 %v4983_v21  ;;  %v5007_v21 = vld [vmem:[%s6315_s8 + $0x50] sm:$0xff]  }
 0x463   :  { %4485 = vmatprep.subr.bf16.mxu1 %v5181_v1 }
 0x466   :  { %4486 = vmatpush3.bf16.msra.mxu1 %v4984_v22  ;;  %v5008_v22 = vld [vmem:[%s6315_s8 + $0x58] sm:$0xff]  }
 0x467   :  { %4487 = vmatprep.subr.bf16.mxu1 %v5181_v1 }
 0x46a   :  { %4488 = vmatpush3.bf16.msra.mxu1 %v4985_v23  ;;  %v5009_v23 = vld [vmem:[%s6315_s8 + $0x60] sm:$0xff]  }
 0x46b   :  { %4489 = vmatprep.subr.bf16.mxu1 %v5181_v1 }
 0x46e   :  { %4490 = vmatpush3.bf16.msra.mxu1 %v4986_v24  ;;  %v5010_v24 = vld [vmem:[%s6315_s8 + $0x68] sm:$0xff]  }
 0x46f   :  { %4491 = vmatprep.subr.bf16.mxu1 %v5181_v1 }
 0x472   :  { %4492 = vmatpush3.bf16.msra.mxu1 %v4987_v25 }
 0x473   :  { %4517 = vmatprep.subr.bf16.mxu1 %v5181_v1 }
 0x520   :  { %v615_v33 = vpop.f32.mrb[12].mxu1 }
 0x521   :  { %v616_v34 = vadd.f32 %v3572_v32, %v615_v33  ;;  %v4469_v35 = vpop.f32.mrb[13].mxu1  ;;  %v5022_v33 = vld [vmem:[%s6317_s10 + $0x48] sm:$0xff]  }
 0x522   :  { %v618_v36 = vpop.f32.mrb[14].mxu1  ;;  %v5024_v35 = vld [vmem:[%s6317_s10 + $0x58] sm:$0xff]  }
 0x523   :  { %v624_v37 = vmul.f32 0.01, %v616_v34  ;;  %v619_v38 = vadd.f32 %v3572_v32, %v618_v36  ;;  %v4470_v39 = vpop.f32.mrb[15].mxu1  ;;  %vm622_vm8 = vcmp.gt.f32.partialorder %v616_v34, 0.0  ;;  %v5021_v32 = vld [vmem:[%s6317_s10 + $0x40] sm:$0xff]  }
 0x524   :  { %v5025_v36 = vld [vmem:[%s6317_s10 + $0x60] sm:$0xff]  }
 0x525   :  { %vm623_vm9 = vcmp.gt.f32.partialorder %v619_v38, 0.0  ;;  %v625_v40 = vmul.f32 0.01, %v619_v38  ;;  %v5499_v41 = vsel %vm622_vm8, %v616_v34, %v624_v37  ;;  %v5023_v34 = vld [vmem:[%s6317_s10 + $0x50] sm:$0xff]   ;;  %v5026_v37 = vld [vmem:[%s6317_s10 + $0x68] sm:$0xff]  }
 0x527   :  { %v5501_v42 = vsel %vm623_vm9, %v619_v38, %v625_v40  ;;  %v3658_v38 = vld [vmem:[%s6314_s7 + $0x1] ss:$0 sm:$0xff] }
 0x528   :  { %v628_v43 = vpack.c.bf16 %v5501_v42, %v5499_v41  ;;  %v690_v44 = vpop.f32.mrb[16].mxu1  ;;  %v5030_v41 = vld [vmem:[%s6309_s2 + $0x80] sm:$0xff]   ;;  %v5031_v42 = vld [vmem:[%s6309_s2 + $0x88] sm:$0xff]  }
 0x529   :  { %v4475_v45 = vpop.f32.mrb[17].mxu1 }
 0x52a   :  { %v693_v46 = vpop.f32.mrb[18].mxu1 }
 0x52b   :  { %v697_v47 = vpack.c.bf16 %v693_v46, %v690_v44  ;;  %v4476_v48 = vpop.f32.mrb[19].mxu1 }
 0x52d   :  { %4494 = vmatmul.mubr.bf16.vlgmr.msra.gmra.mrb[20].mxu1 %v697_v47 }
 0x52e   :  { %4519 = vmatprep.mubr.msk.bf16.mxu1 %vm5182_vm0, %v5181_v1 }
 0x600   :  { %v797_v51 = vpop.f32.mrb[20].mxu1 }
 0x601   :  { %v806_v52 = vmul.f32 0.01, %v797_v51  ;;  %v4495_v53 = vpop.f32.mrb[21].mxu1  ;;  %vm804_vm10 = vcmp.gt.f32.partialorder %v797_v51, 0.0 }
 0x602   :  { %v800_v54 = vpop.f32.mrb[22].mxu1 }
 0x603   :  { %vm805_vm11 = vcmp.gt.f32.partialorder %v800_v54, 0.0  ;;  %v807_v55 = vmul.f32 0.01, %v800_v54  ;;  %v4496_v56 = vpop.f32.mrb[23].mxu1  ;;  %v808_v57 = vsel %vm804_vm10, %v797_v51, %v806_v52  ;;  %v5013_v52 = vld [vmem:[%s6317_s10] sm:$0xff]  }
 0x604   :  { %v5016_v56 = vld [vmem:[%s6317_s10 + $0x18] sm:$0xff]  }
 0x605   :  { %v809_v58 = vsel %vm805_vm11, %v800_v54, %v807_v55  ;;  %v5014_v54 = vld [vmem:[%s6317_s10 + $0x8] sm:$0xff]   ;;  %v5015_v55 = vld [vmem:[%s6317_s10 + $0x10] sm:$0xff]  }
 0x606   :  { %v810_v59 = vpack.c.bf16 %v809_v58, %v808_v57  ;;  %v5017_v57 = vld [vmem:[%s6317_s10 + $0x20] sm:$0xff]   ;;  %v5018_v58 = vld [vmem:[%s6317_s10 + $0x28] sm:$0xff]  }
 0x608   :  { %4514 = vmatmul.mubr.bf16.vlgmr.msra.gmra.mrb[8].mxu0 %v810_v59  ;;  %v5019_v59 = vld [vmem:[%s6317_s10 + $0x30] sm:$0xff]  }
 0x609   :  { %4539 = vmatprep.mubr.msk.bf16.mxu0 %vm5182_vm0, %v5181_v1  ;;  %4524 = vmatpush3.bf16.msra.mxu0 %v4997_v60  ;;  %v5020_v60 = vld [vmem:[%s6317_s10 + $0x38] sm:$0xff]  }
 0x60a   :  { %4525 = vmatprep.subr.bf16.mxu0 %v5181_v1 }
 0x60d   :  { %4526 = vmatpush3.bf16.msra.mxu0 %v4998_v61  ;;  %v5027_v61 = vld [vmem:[%s6317_s10 + $0x70] sm:$0xff]  }
 0x60e   :  { %4527 = vmatprep.subr.bf16.mxu0 %v5181_v1 }
 0x611   :  { %4528 = vmatpush3.bf16.msra.mxu0 %v4999_v62  ;;  %v5028_v62 = vld [vmem:[%s6317_s10 + $0x78] sm:$0xff]  }
 0x612   :  { %4529 = vmatprep.subr.bf16.mxu0 %v5181_v1 }
 0x615   :  { %4530 = vmatpush3.bf16.msra.mxu0 %v5000_v63  ;;  %v5033_v63 = vld [vmem:[%s6309_s2 + $0x98] sm:$0xff]  }
 0x616   :  { %4531 = vmatprep.subr.bf16.mxu0 %v5181_v1 }
 0x619   :  { %4532 = vmatpush3.bf16.msra.mxu0 %v5001_v0  ;;  %v5034_v0 = vld [vmem:[%s6309_s2 + $0xa0] sm:$0xff]  }
 0x61a   :  { %4533 = vmatprep.subr.bf16.mxu0 %v5181_v1 }
 0x61d   :  { %4534 = vmatpush3.bf16.msra.mxu0 %v5002_v2  ;;  %v3684_v2 = vld [vmem:[%s6316_s9 + $0x1] ss:$0 sm:$0xff] }
 0x61e   :  { %4535 = vmatprep.subr.bf16.mxu0 %v5181_v1 }
 0x621   :  { %4536 = vmatpush3.bf16.msra.mxu0 %v5003_v3 }
 0x622   :  { %4537 = vmatprep.subr.bf16.mxu0 %v5181_v1 }
 0x625   :  { %4538 = vmatpush3.bf16.msra.mxu0 %v5004_v18 }
 0x626   :  { %4563 = vmatprep.subr.bf16.mxu0 %v5181_v1 }
 0x6db   :  { %v918_v5 = vpop.f32.mrb[8].mxu0 }
 0x6dc   :  { %v919_v6 = vadd.f32 %v3626_v4, %v918_v5  ;;  %v4515_v7 = vpop.f32.mrb[9].mxu0 }
 0x6dd   :  { %v921_v8 = vpop.f32.mrb[10].mxu0 }
 0x6de   :  { %vm925_vm12 = vcmp.gt.f32.partialorder %v919_v6, 0.0  ;;  %v927_v9 = vmul.f32 0.01, %v919_v6  ;;  %v922_v10 = vadd.f32 %v3626_v4, %v921_v8  ;;  %v4516_v11 = vpop.f32.mrb[11].mxu0 }
 0x6e0   :  { %v929_v12 = vsel %vm925_vm12, %v919_v6, %v927_v9  ;;  %vm926_vm13 = vcmp.gt.f32.partialorder %v922_v10, 0.0  ;;  %v928_v13 = vmul.f32 0.01, %v922_v10 }
 0x6e1   :  { %3635 = vst [vmem:[%s6319_s12 + $0x10] sm:$0xff] %v929_v12 }
 0x6e2   :  { %v930_v14 = vsel %vm926_vm13, %v922_v10, %v928_v13 }
 0x6e3   :  { %3636 = vst [vmem:[%s6319_s12 + $0x18] sm:$0xff] %v930_v14  ;;  %v937_v15 = vpack.c.bf16 %v930_v14, %v929_v12  ;;  %v5029_v14 = vld [vmem:[%s6307_s0 + $0x10] sm:$0xff]  }
 0x6e5   :  { %4518 = vmatpush3.bf16.msra.mxu1 %v937_v15 }
 0x6e6   :  { %4543 = vmatprep.subr.bf16.mxu1 %v5181_v1 }
 0x6e8   :  { %4520 = vmatmul.mubr.msk.bf16.vlgmr.msra.gmra.mrb[24].mxu1 %vm60_vm1, %v4996_v17 }
 0x6e9   :  { %4559 = vmatprep.mubr.msk.bf16.mxu1 %vm5182_vm0, %v5181_v1  ;;  %4544 = vmatpush3.bf16.msra.mxu1 %v5005_v19 }
 0x6ea   :  { %4545 = vmatprep.subr.bf16.mxu1 %v5181_v1 }
 0x6ed   :  { %4546 = vmatpush3.bf16.msra.mxu1 %v5006_v20  ;;  %v5035_v20 = vld [vmem:[%s6309_s2 + $0xa8] sm:$0xff]  }
 0x6ee   :  { %4547 = vmatprep.subr.bf16.mxu1 %v5181_v1 }
 0x6f1   :  { %4548 = vmatpush3.bf16.msra.mxu1 %v5007_v21  ;;  %v5036_v21 = vld [vmem:[%s6309_s2 + $0xb0] sm:$0xff]  }
 0x6f2   :  { %4549 = vmatprep.subr.bf16.mxu1 %v5181_v1 }
 0x6f5   :  { %4550 = vmatpush3.bf16.msra.mxu1 %v5008_v22  ;;  %v5037_v22 = vld [vmem:[%s6309_s2 + $0xb8] sm:$0xff]  }
 0x6f6   :  { %4551 = vmatprep.subr.bf16.mxu1 %v5181_v1 }
 0x6f9   :  { %4552 = vmatpush3.bf16.msra.mxu1 %v5009_v23  ;;  %v5038_v23 = vld [vmem:[%s6310_s3 + $0x80] sm:$0xff]  }
 0x6fa   :  { %4553 = vmatprep.subr.bf16.mxu1 %v5181_v1 }
 0x6fd   :  { %4554 = vmatpush3.bf16.msra.mxu1 %v5010_v24  ;;  %v5039_v24 = vld [vmem:[%s6310_s3 + $0x88] sm:$0xff]  }
 0x6fe   :  { %4555 = vmatprep.subr.bf16.mxu1 %v5181_v1 }
 0x701   :  { %4556 = vmatpush3.bf16.msra.mxu1 %v5011_v30 }
 0x702   :  { %4557 = vmatprep.subr.bf16.mxu1 %v5181_v1 }
 0x705   :  { %4558 = vmatpush3.bf16.msra.mxu1 %v5012_v31 }
 0x706   :  { %4583 = vmatprep.subr.bf16.mxu1 %v5181_v1 }
 0x7bb   :  { %v980_v25 = vpop.f32.mrb[24].mxu1 }
 0x7bc   :  { %v4521_v26 = vpop.f32.mrb[25].mxu1 }
 0x7bd   :  { %v983_v27 = vpop.f32.mrb[26].mxu1  ;;  %v5041_v26 = vld [vmem:[%s6310_s3 + $0x98] sm:$0xff]  }
 0x7be   :  { %v987_v28 = vpack.c.bf16 %v983_v27, %v980_v25  ;;  %v4522_v29 = vpop.f32.mrb[27].mxu1  ;;  %v5040_v25 = vld [vmem:[%s6310_s3 + $0x90] sm:$0xff]   ;;  %v5042_v27 = vld [vmem:[%s6310_s3 + $0xa0] sm:$0xff]  }
 0x7c0   :  { %4540 = vmatmul.mubr.bf16.vlgmr.msra.gmra.mrb[12].mxu0 %v987_v28  ;;  %v5043_v28 = vld [vmem:[%s6310_s3 + $0xa8] sm:$0xff]  }
 0x7c1   :  { %4579 = vmatprep.mubr.msk.bf16.mxu0 %vm5182_vm0, %v5181_v1  ;;  %4564 = vmatpush3.bf16.msra.mxu0 %v5021_v32 }
 0x7c2   :  { %4565 = vmatprep.subr.bf16.mxu0 %v5181_v1 }
 0x7c5   :  { %4566 = vmatpush3.bf16.msra.mxu0 %v5022_v33 }
 0x7c6   :  { %4567 = vmatprep.subr.bf16.mxu0 %v5181_v1 }
 0x7c9   :  { %4568 = vmatpush3.bf16.msra.mxu0 %v5023_v34 }
 0x7ca   :  { %4569 = vmatprep.subr.bf16.mxu0 %v5181_v1 }
 0x7cd   :  { %4570 = vmatpush3.bf16.msra.mxu0 %v5024_v35 }
 0x7ce   :  { %4571 = vmatprep.subr.bf16.mxu0 %v5181_v1 }
 0x7d1   :  { %4572 = vmatpush3.bf16.msra.mxu0 %v5025_v36 }
 0x7d2   :  { %4573 = vmatprep.subr.bf16.mxu0 %v5181_v1 }
 0x7d5   :  { %4574 = vmatpush3.bf16.msra.mxu0 %v5026_v37 }
 0x7d6   :  { %4575 = vmatprep.subr.bf16.mxu0 %v5181_v1 }
 0x7d9   :  { %4576 = vmatpush3.bf16.msra.mxu0 %v5027_v61  ;;  %v3770_v61 = vld [vmem:[%s6311_s4 + $0x2] ss:$0 sm:$0xff] }
 0x7da   :  { %4577 = vmatprep.subr.bf16.mxu0 %v5181_v1 }
 0x7dd   :  { %4578 = vmatpush3.bf16.msra.mxu0 %v5028_v62 }
 0x7de   :  { %4603 = vmatprep.subr.bf16.mxu0 %v5181_v1 }
 0x893   :  { %v1095_v39 = vpop.f32.mrb[12].mxu0 }
 0x894   :  { %v1096_v40 = vadd.f32 %v3658_v38, %v1095_v39  ;;  %v4541_v44 = vpop.f32.mrb[13].mxu0 }
 0x895   :  { %v1098_v45 = vpop.f32.mrb[14].mxu0  ;;  %v5045_v44 = vld [vmem:[%s6310_s3 + $0xb8] sm:$0xff]  }
 0x896   :  { %v1104_v46 = vmul.f32 0.01, %v1096_v40  ;;  %v1099_v47 = vadd.f32 %v3658_v38, %v1098_v45  ;;  %v4542_v48 = vpop.f32.mrb[15].mxu0  ;;  %vm1102_vm14 = vcmp.gt.f32.partialorder %v1096_v40, 0.0 }
 0x898   :  { %vm1103_vm15 = vcmp.gt.f32.partialorder %v1099_v47, 0.0  ;;  %v1105_v49 = vmul.f32 0.01, %v1099_v47  ;;  %v1106_v50 = vsel %vm1102_vm14, %v1096_v40, %v1104_v46  ;;  %v5044_v40 = vld [vmem:[%s6310_s3 + $0xb0] sm:$0xff]  }
 0x89a   :  { %v1107_v51 = vsel %vm1103_vm15, %v1099_v47, %v1105_v49 }
 0x89b   :  { %v1108_v53 = vpack.c.bf16 %v1107_v51, %v1106_v50 }
 0x89d   :  { %4560 = vmatmul.mubr.bf16.vlgmr.msra.gmra.mrb[28].mxu1 %v1108_v53 }
 0x89e   :  { %4584 = vmatpush3.bf16.msra.mxu1 %v5013_v52  ;;  %4599 = vmatprep.mubr.msk.bf16.mxu1 %vm5182_vm0, %v5181_v1 }
 0x89f   :  { %4585 = vmatprep.subr.bf16.mxu1 %v5181_v1 }
 0x8a2   :  { %4586 = vmatpush3.bf16.msra.mxu1 %v5014_v54  ;;  %v5047_v54 = vld [vmem:[%s6313_s6 + $0x80] sm:$0xff]  }
 0x8a3   :  { %4587 = vmatprep.subr.bf16.mxu1 %v5181_v1 }
 0x8a6   :  { %4588 = vmatpush3.bf16.msra.mxu1 %v5015_v55  ;;  %v5048_v55 = vld [vmem:[%s6313_s6 + $0x88] sm:$0xff]  }
 0x8a7   :  { %4589 = vmatprep.subr.bf16.mxu1 %v5181_v1 }
 0x8aa   :  { %4590 = vmatpush3.bf16.msra.mxu1 %v5016_v56  ;;  %v5049_v56 = vld [vmem:[%s6313_s6 + $0x90] sm:$0xff]  }
 0x8ab   :  { %4591 = vmatprep.subr.bf16.mxu1 %v5181_v1 }
 0x8ae   :  { %4592 = vmatpush3.bf16.msra.mxu1 %v5017_v57  ;;  %v5050_v57 = vld [vmem:[%s6313_s6 + $0x98] sm:$0xff]  }
 0x8af   :  { %4593 = vmatprep.subr.bf16.mxu1 %v5181_v1 }
 0x8b2   :  { %4594 = vmatpush3.bf16.msra.mxu1 %v5018_v58  ;;  %v5051_v58 = vld [vmem:[%s6313_s6 + $0xa0] sm:$0xff]  }
 0x8b3   :  { %4595 = vmatprep.subr.bf16.mxu1 %v5181_v1 }
 0x8b6   :  { %4596 = vmatpush3.bf16.msra.mxu1 %v5019_v59  ;;  %v5052_v59 = vld [vmem:[%s6313_s6 + $0xa8] sm:$0xff]  }
 0x8b7   :  { %4597 = vmatprep.subr.bf16.mxu1 %v5181_v1 }
 0x8ba   :  { %4598 = vmatpush3.bf16.msra.mxu1 %v5020_v60  ;;  %v5053_v60 = vld [vmem:[%s6313_s6 + $0xb0] sm:$0xff]  }
 0x8bb   :  { %4609 = vmatprep.subr.bf16.mxu1 %v5181_v1 }
 0x8bd   :  { %4600 = vmatmul.mubr.bf16.vlgmr.msra.gmra.mrb[32].mxu1 %v628_v43  ;;  %v5032_v43 = vld [vmem:[%s6309_s2 + $0x90] sm:$0xff]  }
 0x8be   :  { %4625 = vmatprep.mubr.msk.bf16.mxu1 %vm5182_vm0, %v5181_v1  ;;  %4610 = vmatpush3.bf16.msra.mxu1 %v5030_v41 }
 0x8bf   :  { %4611 = vmatprep.subr.bf16.mxu1 %v5181_v1 }
 0x8c2   :  { %4612 = vmatpush3.bf16.msra.mxu1 %v5031_v42 }
 0x8c3   :  { %4613 = vmatprep.subr.bf16.mxu1 %v5181_v1 }
 0x8c6   :  { %4614 = vmatpush3.bf16.msra.mxu1 %v5032_v43 }
 0x8c7   :  { %4615 = vmatprep.subr.bf16.mxu1 %v5181_v1 }
 0x8ca   :  { %4616 = vmatpush3.bf16.msra.mxu1 %v5033_v63 }
 0x8cb   :  { %4617 = vmatprep.subr.bf16.mxu1 %v5181_v1 }
 0x8ce   :  { %4618 = vmatpush3.bf16.msra.mxu1 %v5034_v0 }
 0x8cf   :  { %4619 = vmatprep.subr.bf16.mxu1 %v5181_v1 }
 0x8d2   :  { %4620 = vmatpush3.bf16.msra.mxu1 %v5035_v20 }
 0x8d3   :  { %4621 = vmatprep.subr.bf16.mxu1 %v5181_v1 }
 0x8d6   :  { %4622 = vmatpush3.bf16.msra.mxu1 %v5036_v21  ;;  %v5061_v21 = vld [vmem:[%s6315_s8 + $0xb0] sm:$0xff]  }
 0x8d7   :  { %4623 = vmatprep.subr.bf16.mxu1 %v5181_v1 }
 0x8da   :  { %4624 = vmatpush3.bf16.msra.mxu1 %v5037_v22  ;;  %v5062_v22 = vld [vmem:[%s6315_s8 + $0xb8] sm:$0xff]  }
 0x8db   :  { %4649 = vmatprep.subr.bf16.mxu1 %v5181_v1 }
 0x970   :  { %v1216_v3 = vpop.f32.mrb[28].mxu1 }
 0x971   :  { %v1217_v4 = vadd.f32 %v3684_v2, %v1216_v3  ;;  %v4561_v5 = vpop.f32.mrb[29].mxu1 }
 0x972   :  { %v1219_v6 = vpop.f32.mrb[30].mxu1 }
 0x973   :  { %v1225_v7 = vmul.f32 0.01, %v1217_v4  ;;  %v1220_v8 = vadd.f32 %v3684_v2, %v1219_v6  ;;  %v4562_v9 = vpop.f32.mrb[31].mxu1  ;;  %vm1223_vm2 = vcmp.gt.f32.partialorder %v1217_v4, 0.0 }
 0x974   :  { %v5055_v9 = vld [vmem:[%s6315_s8 + $0x80] sm:$0xff]  }
 0x975   :  { %vm1224_vm3 = vcmp.gt.f32.partialorder %v1220_v8, 0.0  ;;  %v1226_v10 = vmul.f32 0.01, %v1220_v8  ;;  %v1227_v11 = vsel %vm1223_vm2, %v1217_v4, %v1225_v7  ;;  %v5046_v7 = vld [vmem:[%s6312_s5 + $0x10] sm:$0xff]  }
 0x977   :  { %v1228_v12 = vsel %vm1224_vm3, %v1220_v8, %v1226_v10  ;;  %v5054_v8 = vld [vmem:[%s6313_s6 + $0xb8] sm:$0xff]   ;;  %v5056_v10 = vld [vmem:[%s6315_s8 + $0x88] sm:$0xff]  }
 0x978   :  { %v1229_v13 = vpack.c.bf16 %v1228_v12, %v1227_v11  ;;  %v5057_v11 = vld [vmem:[%s6315_s8 + $0x90] sm:$0xff]   ;;  %v5058_v12 = vld [vmem:[%s6315_s8 + $0x98] sm:$0xff]  }
 0x97a   :  { %4580 = vmatmul.mubr.bf16.vlgmr.msra.gmra.mrb[16].mxu0 %v1229_v13  ;;  %v5059_v13 = vld [vmem:[%s6315_s8 + $0xa0] sm:$0xff]  }
 0x97b   :  { %4604 = vmatpush3.bf16.msra.mxu0 %v5428_v16  ;;  %4605 = vmatprep.mubr.msk.bf16.mxu0 %vm5182_vm0, %v5181_v1 }
 0x97c   :  { %4629 = vmatprep.subr.bf16.mxu0 %v5181_v1 }
 0x982   :  { %4606 = vmatmul.mubr.msk.bf16.vlgmr.msra.gmra.mrb[20].mxu0 %vm60_vm1, %v5029_v14  ;;  %v5060_v14 = vld [vmem:[%s6315_s8 + $0xa8] sm:$0xff]  }
 0x983   :  { %4645 = vmatprep.mubr.msk.bf16.mxu0 %vm5182_vm0, %v5181_v1  ;;  %4630 = vmatpush3.bf16.msra.mxu0 %v5038_v23  ;;  %v5064_v23 = vld [vmem:[%s6317_s10 + $0x80] sm:$0xff]  }
 0x984   :  { %4631 = vmatprep.subr.bf16.mxu0 %v5181_v1 }
 0x987   :  { %4632 = vmatpush3.bf16.msra.mxu0 %v5039_v24  ;;  %v5066_v24 = vld [vmem:[%s6317_s10 + $0x88] sm:$0xff]  }
 0x988   :  { %4633 = vmatprep.subr.bf16.mxu0 %v5181_v1 }
 0x98b   :  { %4634 = vmatpush3.bf16.msra.mxu0 %v5040_v25  ;;  %v5068_v25 = vld [vmem:[%s6317_s10 + $0x90] sm:$0xff]  }
 0x98c   :  { %4635 = vmatprep.subr.bf16.mxu0 %v5181_v1 }
 0x98f   :  { %4636 = vmatpush3.bf16.msra.mxu0 %v5041_v26  ;;  %v5070_v26 = vld [vmem:[%s6317_s10 + $0x98] sm:$0xff]  }
 0x990   :  { %v1418_v15 = vpop.f32.mrb[32].mxu1  ;;  %4637 = vmatprep.subr.bf16.mxu0 %v5181_v1 }
 0x991   :  { %v4601_v17 = vpop.f32.mrb[33].mxu1 }
 0x992   :  { %v1421_v18 = vpop.f32.mrb[34].mxu1 }
 0x993   :  { %v4602_v19 = vpop.f32.mrb[35].mxu1  ;;  %4638 = vmatpush3.bf16.msra.mxu0 %v5042_v27  ;;  %v5072_v27 = vld [vmem:[%s6317_s10 + $0xa0] sm:$0xff]  }
 0x994   :  { %4639 = vmatprep.subr.bf16.mxu0 %v5181_v1 }
 0x997   :  { %4640 = vmatpush3.bf16.msra.mxu0 %v5043_v28  ;;  %v5074_v28 = vld [vmem:[%s6317_s10 + $0xa8] sm:$0xff]  }
 0x998   :  { %4641 = vmatprep.subr.bf16.mxu0 %v5181_v1 }
 0x99b   :  { %4642 = vmatpush3.bf16.msra.mxu0 %v5044_v40 }
 0x99c   :  { %4643 = vmatprep.subr.bf16.mxu0 %v5181_v1 }
 0x99f   :  { %4644 = vmatpush3.bf16.msra.mxu0 %v5045_v44 }
 0x9a0   :  { %4655 = vmatprep.subr.bf16.mxu0 %v5181_v1 }
 0xa4d   :  { %v1329_v29 = vpop.f32.mrb[16].mxu0 }
 0xa4e   :  { %v5742_v30 = vadd.f32 %v1418_v15, %v1329_v29  ;;  %v4581_v31 = vpop.f32.mrb[17].mxu0  ;;  %v3802_v29 = vld [vmem:[%s6314_s7 + $0x2] ss:$0 sm:$0xff] }
 0xa4f   :  { %v1332_v32 = vpop.f32.mrb[18].mxu0 }
 0xa50   :  { %v5744_v33 = vadd.f32 %v1421_v18, %v1332_v32  ;;  %v4582_v34 = vpop.f32.mrb[19].mxu0 }
 0xa55   :  { %v1470_v35 = vpop.f32.mrb[20].mxu0 }
 0xa56   :  { %v4607_v36 = vpop.f32.mrb[21].mxu0 }
 0xa57   :  { %v1473_v37 = vpop.f32.mrb[22].mxu0 }
 0xa58   :  { %v1477_v38 = vpack.c.bf16 %v1473_v37, %v1470_v35  ;;  %v4608_v39 = vpop.f32.mrb[23].mxu0 }
 0xa5a   :  { %4626 = vmatmul.mubr.bf16.vlgmr.msra.gmra.mrb[36].mxu1 %v1477_v38 }
 0xa5b   :  { %4651 = vmatprep.mubr.msk.bf16.mxu1 %vm5182_vm0, %v5181_v1 }
 0xb2d   :  { %v1577_v45 = vpop.f32.mrb[36].mxu1 }
 0xb2e   :  { %v1586_v46 = vmul.f32 0.01, %v1577_v45  ;;  %v4627_v47 = vpop.f32.mrb[37].mxu1  ;;  %vm1584_vm4 = vcmp.gt.f32.partialorder %v1577_v45, 0.0 }
 0xb2f   :  { %v1580_v48 = vpop.f32.mrb[38].mxu1  ;;  %v5065_v47 = vld [vmem:[%s6309_s2 + $0xc0] sm:$0xff]  }
 0xb30   :  { %vm1585_vm5 = vcmp.gt.f32.partialorder %v1580_v48, 0.0  ;;  %v1587_v49 = vmul.f32 0.01, %v1580_v48  ;;  %v4628_v50 = vpop.f32.mrb[39].mxu1  ;;  %v1588_v51 = vsel %vm1584_vm4, %v1577_v45, %v1586_v46  ;;  %v5063_v46 = vld [vmem:[%s6307_s0 + $0x18] sm:$0xff]  }
 0xb31   :  { %v5073_v50 = vld [vmem:[%s6309_s2 + $0xe0] sm:$0xff]  }
 0xb32   :  { %v1589_v52 = vsel %vm1585_vm5, %v1580_v48, %v1587_v49  ;;  %v5069_v48 = vld [vmem:[%s6309_s2 + $0xd0] sm:$0xff]   ;;  %v5071_v49 = vld [vmem:[%s6309_s2 + $0xd8] sm:$0xff]  }
 0xb33   :  { %v1590_v53 = vpack.c.bf16 %v1589_v52, %v1588_v51  ;;  %v5075_v51 = vld [vmem:[%s6309_s2 + $0xe8] sm:$0xff]   ;;  %v5076_v52 = vld [vmem:[%s6317_s10 + $0xb0] sm:$0xff]  }
 0xb35   :  { %4646 = vmatmul.mubr.bf16.vlgmr.msra.gmra.mrb[24].mxu0 %v1590_v53  ;;  %v5077_v53 = vld [vmem:[%s6309_s2 + $0xf0] sm:$0xff]  }
 0xb36   :  { %4671 = vmatprep.mubr.msk.bf16.mxu0 %vm5182_vm0, %v5181_v1  ;;  %4656 = vmatpush3.bf16.msra.mxu0 %v5047_v54  ;;  %v5078_v54 = vld [vmem:[%s6317_s10 + $0xb8] sm:$0xff]  }
 0xb37   :  { %4657 = vmatprep.subr.bf16.mxu0 %v5181_v1 }
 0xb3a   :  { %4658 = vmatpush3.bf16.msra.mxu0 %v5048_v55  ;;  %v5079_v55 = vld [vmem:[%s6309_s2 + $0xf8] sm:$0xff]  }
 0xb3b   :  { %4659 = vmatprep.subr.bf16.mxu0 %v5181_v1 }
 0xb3e   :  { %4660 = vmatpush3.bf16.msra.mxu0 %v5049_v56  ;;  %v3828_v56 = vld [vmem:[%s6316_s9 + $0x2] ss:$0 sm:$0xff] }
 0xb3f   :  { %4661 = vmatprep.subr.bf16.mxu0 %v5181_v1 }
 0xb42   :  { %4662 = vmatpush3.bf16.msra.mxu0 %v5050_v57 }
 0xb43   :  { %4663 = vmatprep.subr.bf16.mxu0 %v5181_v1 }
 0xb46   :  { %4664 = vmatpush3.bf16.msra.mxu0 %v5051_v58 }
 0xb47   :  { %4665 = vmatprep.subr.bf16.mxu0 %v5181_v1 }
 0xb4a   :  { %4666 = vmatpush3.bf16.msra.mxu0 %v5052_v59 }
 0xb4b   :  { %4667 = vmatprep.subr.bf16.mxu0 %v5181_v1 }
 0xb4e   :  { %4668 = vmatpush3.bf16.msra.mxu0 %v5053_v60 }
 0xb4f   :  { %4669 = vmatprep.subr.bf16.mxu0 %v5181_v1 }
 0xb52   :  { %4670 = vmatpush3.bf16.msra.mxu0 %v5054_v8  ;;  %v5081_v8 = vld [vmem:[%s6310_s3 + $0xc8] sm:$0xff]  }
 0xb53   :  { %4695 = vmatprep.subr.bf16.mxu0 %v5181_v1 }
 0xc08   :  { %v1698_v62 = vpop.f32.mrb[24].mxu0 }
 0xc09   :  { %v1699_v41 = vadd.f32 %v3770_v61, %v1698_v62  ;;  %v4647_v42 = vpop.f32.mrb[25].mxu0 }
 0xc0a   :  { %v1701_v43 = vpop.f32.mrb[26].mxu0 }
 0xc0b   :  { %vm1705_vm6 = vcmp.gt.f32.partialorder %v1699_v41, 0.0  ;;  %v1707_v63 = vmul.f32 0.01, %v1699_v41  ;;  %v1702_v0 = vadd.f32 %v3770_v61, %v1701_v43  ;;  %v4648_v2 = vpop.f32.mrb[27].mxu0 }
 0xc0d   :  { %v1709_v3 = vsel %vm1705_vm6, %v1699_v41, %v1707_v63  ;;  %vm1706_vm7 = vcmp.gt.f32.partialorder %v1702_v0, 0.0  ;;  %v1708_v4 = vmul.f32 0.01, %v1702_v0 }
 0xc0e   :  { %3779 = vst [vmem:[%s6319_s12 + $0x20] sm:$0xff] %v1709_v3 }
 0xc0f   :  { %v1710_v5 = vsel %vm1706_vm7, %v1702_v0, %v1708_v4  ;;  %v5080_v0 = vld [vmem:[%s6310_s3 + $0xc0] sm:$0xff]  }
 0xc10   :  { %3780 = vst [vmem:[%s6319_s12 + $0x28] sm:$0xff] %v1710_v5  ;;  %v1717_v6 = vpack.c.bf16 %v1710_v5, %v1709_v3 }
 0xc12   :  { %4650 = vmatpush3.bf16.msra.mxu1 %v1717_v6 }
 0xc13   :  { %4675 = vmatprep.subr.bf16.mxu1 %v5181_v1 }
 0xc15   :  { %4652 = vmatmul.mubr.msk.bf16.vlgmr.msra.gmra.mrb[40].mxu1 %vm60_vm1, %v5046_v7 }
 0xc16   :  { %4691 = vmatprep.mubr.msk.bf16.mxu1 %vm5182_vm0, %v5181_v1  ;;  %4676 = vmatpush3.bf16.msra.mxu1 %v5055_v9  ;;  %v5082_v9 = vld [vmem:[%s6310_s3 + $0xd0] sm:$0xff]  }
 0xc17   :  { %4677 = vmatprep.subr.bf16.mxu1 %v5181_v1 }
 0xc1a   :  { %4678 = vmatpush3.bf16.msra.mxu1 %v5056_v10  ;;  %v5083_v10 = vld [vmem:[%s6310_s3 + $0xd8] sm:$0xff]  }
 0xc1b   :  { %4679 = vmatprep.subr.bf16.mxu1 %v5181_v1 }
 0xc1e   :  { %4680 = vmatpush3.bf16.msra.mxu1 %v5057_v11  ;;  %v5084_v11 = vld [vmem:[%s6310_s3 + $0xe0] sm:$0xff]  }
 0xc1f   :  { %4681 = vmatprep.subr.bf16.mxu1 %v5181_v1 }
 0xc22   :  { %4682 = vmatpush3.bf16.msra.mxu1 %v5058_v12  ;;  %v5085_v12 = vld [vmem:[%s6310_s3 + $0xe8] sm:$0xff]  }
 0xc23   :  { %4683 = vmatprep.subr.bf16.mxu1 %v5181_v1 }
 0xc26   :  { %4684 = vmatpush3.bf16.msra.mxu1 %v5059_v13  ;;  %v5086_v13 = vld [vmem:[%s6310_s3 + $0xf0] sm:$0xff]  }
 0xc27   :  { %4685 = vmatprep.subr.bf16.mxu1 %v5181_v1 }
 0xc2a   :  { %4686 = vmatpush3.bf16.msra.mxu1 %v5060_v14  ;;  %v5087_v14 = vld [vmem:[%s6310_s3 + $0xf8] sm:$0xff]  }
 0xc2b   :  { %4687 = vmatprep.subr.bf16.mxu1 %v5181_v1 }
 0xc2e   :  { %4688 = vmatpush3.bf16.msra.mxu1 %v5061_v21 }
 0xc2f   :  { %4689 = vmatprep.subr.bf16.mxu1 %v5181_v1 }
 0xc32   :  { %4690 = vmatpush3.bf16.msra.mxu1 %v5062_v22 }
 0xc33   :  { %4715 = vmatprep.subr.bf16.mxu1 %v5181_v1 }
 0xce8   :  { %v1760_v15 = vpop.f32.mrb[40].mxu1 }
 0xce9   :  { %v4653_v17 = vpop.f32.mrb[41].mxu1 }
 0xcea   :  { %v1763_v18 = vpop.f32.mrb[42].mxu1 }
 0xceb   :  { %v1767_v19 = vpack.c.bf16 %v1763_v18, %v1760_v15  ;;  %v4654_v20 = vpop.f32.mrb[43].mxu1 }
 0xced   :  { %4672 = vmatmul.mubr.bf16.vlgmr.msra.gmra.mrb[28].mxu0 %v1767_v19 }
 0xcee   :  { %4711 = vmatprep.mubr.msk.bf16.mxu0 %vm5182_vm0, %v5181_v1  ;;  %4696 = vmatpush3.bf16.msra.mxu0 %v5064_v23 }
 0xcef   :  { %4697 = vmatprep.subr.bf16.mxu0 %v5181_v1 }
 0xcf2   :  { %4698 = vmatpush3.bf16.msra.mxu0 %v5066_v24 }
 0xcf3   :  { %4699 = vmatprep.subr.bf16.mxu0 %v5181_v1 }
 0xcf6   :  { %4700 = vmatpush3.bf16.msra.mxu0 %v5068_v25 }
 0xcf7   :  { %4701 = vmatprep.subr.bf16.mxu0 %v5181_v1 }
 0xcfa   :  { %4702 = vmatpush3.bf16.msra.mxu0 %v5070_v26 }
 0xcfb   :  { %4703 = vmatprep.subr.bf16.mxu0 %v5181_v1 }
 0xcfe   :  { %4704 = vmatpush3.bf16.msra.mxu0 %v5072_v27 }
 0xcff   :  { %4705 = vmatprep.subr.bf16.mxu0 %v5181_v1 }
 0xd02   :  { %4706 = vmatpush3.bf16.msra.mxu0 %v5074_v28 }
 0xd03   :  { %4707 = vmatprep.subr.bf16.mxu0 %v5181_v1 }
 0xd06   :  { %4708 = vmatpush3.bf16.msra.mxu0 %v5076_v52  ;;  %v5095_v52 = vld [vmem:[%s6313_s6 + $0xf0] sm:$0xff]  }
 0xd07   :  { %4709 = vmatprep.subr.bf16.mxu0 %v5181_v1 }
 0xd0a   :  { %4710 = vmatpush3.bf16.msra.mxu0 %v5078_v54  ;;  %v5097_v54 = vld [vmem:[%s6315_s8 + $0xc0] sm:$0xff]  }
 0xd0b   :  { %4741 = vmatprep.subr.bf16.mxu0 %v5181_v1 }
 0xdc0   :  { %v1875_v31 = vpop.f32.mrb[28].mxu0 }
 0xdc1   :  { %v1876_v32 = vadd.f32 %v3802_v29, %v1875_v31  ;;  %v4673_v34 = vpop.f32.mrb[29].mxu0 }
 0xdc2   :  { %v1878_v35 = vpop.f32.mrb[30].mxu0 }
 0xdc3   :  { %v1884_v36 = vmul.f32 0.01, %v1876_v32  ;;  %v1879_v37 = vadd.f32 %v3802_v29, %v1878_v35  ;;  %v4674_v38 = vpop.f32.mrb[31].mxu0  ;;  %vm1882_vm8 = vcmp.gt.f32.partialorder %v1876_v32, 0.0 }
 0xdc5   :  { %vm1883_vm9 = vcmp.gt.f32.partialorder %v1879_v37, 0.0  ;;  %v1885_v39 = vmul.f32 0.01, %v1879_v37  ;;  %v1886_v40 = vsel %vm1882_vm8, %v1876_v32, %v1884_v36 }
 0xdc7   :  { %v1887_v44 = vsel %vm1883_vm9, %v1879_v37, %v1885_v39 }
 0xdc8   :  { %v1888_v45 = vpack.c.bf16 %v1887_v44, %v1886_v40 }
 0xdca   :  { %4692 = vmatmul.mubr.bf16.vlgmr.msra.gmra.mrb[44].mxu1 %v1888_v45 }
 0xdcb   :  { %4716 = vmatpush3.bf16.msra.mxu1 %v5428_v16  ;;  %4717 = vmatprep.mubr.msk.bf16.mxu1 %vm5182_vm0, %v5181_v1  ;;  %v5067_v16 = vld [vmem:[%s6309_s2 + $0xc8] sm:$0xff]  }
 0xdcc   :  { %4721 = vmatprep.subr.bf16.mxu1 %v5181_v1 }
 0xdd2   :  { %4718 = vmatmul.mubr.msk.bf16.vlgmr.msra.gmra.mrb[48].mxu1 %vm60_vm1, %v5063_v46  ;;  %v5088_v46 = vld [vmem:[%s6312_s5 + $0x18] sm:$0xff]  }
 0xdd3   :  { %4722 = vmatpush3.bf16.msra.mxu1 %v5065_v47  ;;  %4737 = vmatprep.mubr.msk.bf16.mxu1 %vm5182_vm0, %v5181_v1  ;;  %v5089_v47 = vld [vmem:[%s6313_s6 + $0xc0] sm:$0xff]  }
 0xdd4   :  { %4723 = vmatprep.subr.bf16.mxu1 %v5181_v1 }
 0xdd7   :  { %4724 = vmatpush3.bf16.msra.mxu1 %v5067_v16  ;;  %v5090_v16 = vld [vmem:[%s6313_s6 + $0xc8] sm:$0xff]  }
 0xdd8   :  { %4725 = vmatprep.subr.bf16.mxu1 %v5181_v1 }
 0xddb   :  { %4726 = vmatpush3.bf16.msra.mxu1 %v5069_v48  ;;  %v5091_v48 = vld [vmem:[%s6313_s6 + $0xd0] sm:$0xff]  }
 0xddc   :  { %4727 = vmatprep.subr.bf16.mxu1 %v5181_v1 }
 0xddf   :  { %4728 = vmatpush3.bf16.msra.mxu1 %v5071_v49  ;;  %v5092_v49 = vld [vmem:[%s6313_s6 + $0xd8] sm:$0xff]  }
 0xde0   :  { %4729 = vmatprep.subr.bf16.mxu1 %v5181_v1 }
 0xde3   :  { %4730 = vmatpush3.bf16.msra.mxu1 %v5073_v50  ;;  %v5093_v50 = vld [vmem:[%s6313_s6 + $0xe0] sm:$0xff]  }
 0xde4   :  { %4731 = vmatprep.subr.bf16.mxu1 %v5181_v1 }
 0xde7   :  { %4732 = vmatpush3.bf16.msra.mxu1 %v5075_v51  ;;  %v5094_v51 = vld [vmem:[%s6313_s6 + $0xe8] sm:$0xff]  }
 0xde8   :  { %4733 = vmatprep.subr.bf16.mxu1 %v5181_v1 }
 0xdeb   :  { %4734 = vmatpush3.bf16.msra.mxu1 %v5077_v53  ;;  %v5096_v53 = vld [vmem:[%s6313_s6 + $0xf8] sm:$0xff]  }
 0xdec   :  { %4735 = vmatprep.subr.bf16.mxu1 %v5181_v1 }
 0xdef   :  { %4736 = vmatpush3.bf16.msra.mxu1 %v5079_v55  ;;  %v5098_v55 = vld [vmem:[%s6315_s8 + $0xc8] sm:$0xff]  }
 0xdf0   :  { %4761 = vmatprep.subr.bf16.mxu1 %v5181_v1 }
 0xe9d   :  { %v1996_v57 = vpop.f32.mrb[44].mxu1 }
 0xe9e   :  { %v1997_v58 = vadd.f32 %v3828_v56, %v1996_v57  ;;  %v4693_v59 = vpop.f32.mrb[45].mxu1  ;;  %v5100_v57 = vld [vmem:[%s6315_s8 + $0xd8] sm:$0xff]  }
 0xe9f   :  { %v1999_v60 = vpop.f32.mrb[46].mxu1  ;;  %v5102_v59 = vld [vmem:[%s6315_s8 + $0xe8] sm:$0xff]  }
 0xea0   :  { %v2005_v61 = vmul.f32 0.01, %v1997_v58  ;;  %v2000_v62 = vadd.f32 %v3828_v56, %v1999_v60  ;;  %v4694_v41 = vpop.f32.mrb[47].mxu1  ;;  %vm2003_vm10 = vcmp.gt.f32.partialorder %v1997_v58, 0.0  ;;  %v5099_v56 = vld [vmem:[%s6315_s8 + $0xd0] sm:$0xff]  }
 0xea2   :  { %vm2004_vm11 = vcmp.gt.f32.partialorder %v2000_v62, 0.0  ;;  %v2006_v42 = vmul.f32 0.01, %v2000_v62  ;;  %v2007_v43 = vsel %vm2003_vm10, %v1997_v58, %v2005_v61  ;;  %v5101_v58 = vld [vmem:[%s6315_s8 + $0xe0] sm:$0xff]  }
 0xea4   :  { %v2008_v63 = vsel %vm2004_vm11, %v2000_v62, %v2006_v42 }
 0xea5   :  { %v2009_v2 = vpack.c.bf16 %v2008_v63, %v2007_v43  ;;  %v2163_v3 = vpop.f32.mrb[48].mxu1  ;;  %v5103_v43 = vld [vmem:[%s6315_s8 + $0xf0] sm:$0xff]   ;;  %v5104_v63 = vld [vmem:[%s6315_s8 + $0xf8] sm:$0xff]  }
 0xea6   :  { %v4719_v4 = vpop.f32.mrb[49].mxu1 }
 0xea7   :  { %4712 = vmatmul.mubr.bf16.vlgmr.msra.gmra.mrb[32].mxu0 %v2009_v2  ;;  %v2166_v5 = vpop.f32.mrb[50].mxu1  ;;  %v5108_v2 = vld [vmem:[%s6317_s10 + $0xc8] sm:$0xff]   ;;  %v5112_v4 = vld [vmem:[%s6317_s10 + $0xd8] sm:$0xff]  }
 0xea8   :  { %v2170_v6 = vpack.c.bf16 %v2166_v5, %v2163_v3  ;;  %v4720_v7 = vpop.f32.mrb[51].mxu1  ;;  %4742 = vmatpush3.bf16.msra.mxu0 %v5080_v0  ;;  %4757 = vmatprep.mubr.msk.bf16.mxu0 %vm5182_vm0, %v5181_v1  ;;  %v5106_v0 = vld [vmem:[%s6317_s10 + $0xc0] sm:$0xff]   ;;  %v5110_v3 = vld [vmem:[%s6317_s10 + $0xd0] sm:$0xff]  }
 0xea9   :  { %4743 = vmatprep.subr.bf16.mxu0 %v5181_v1  ;;  %v5114_v5 = vld [vmem:[%s6317_s10 + $0xe0] sm:$0xff]  }
 0xeaa   :  { %4738 = vmatmul.mubr.bf16.vlgmr.msra.gmra.mrb[52].mxu1 %v2170_v6  ;;  %v5116_v6 = vld [vmem:[%s6317_s10 + $0xe8] sm:$0xff]   ;;  %v3938_v7 = vld [vmem:[%s6314_s7 + $0x3] ss:$0 sm:$0xff] }
 0xeab   :  { %4763 = vmatprep.mubr.msk.bf16.mxu1 %vm5182_vm0, %v5181_v1 }
 0xeac   :  { %4744 = vmatpush3.bf16.msra.mxu0 %v5081_v8 }
 0xead   :  { %4745 = vmatprep.subr.bf16.mxu0 %v5181_v1 }
 0xeb0   :  { %4746 = vmatpush3.bf16.msra.mxu0 %v5082_v9 }
 0xeb1   :  { %4747 = vmatprep.subr.bf16.mxu0 %v5181_v1 }
 0xeb4   :  { %4748 = vmatpush3.bf16.msra.mxu0 %v5083_v10 }
 0xeb5   :  { %4749 = vmatprep.subr.bf16.mxu0 %v5181_v1 }
 0xeb8   :  { %4750 = vmatpush3.bf16.msra.mxu0 %v5084_v11 }
 0xeb9   :  { %4751 = vmatprep.subr.bf16.mxu0 %v5181_v1 }
 0xebc   :  { %4752 = vmatpush3.bf16.msra.mxu0 %v5085_v12 }
 0xebd   :  { %4753 = vmatprep.subr.bf16.mxu0 %v5181_v1 }
 0xec0   :  { %4754 = vmatpush3.bf16.msra.mxu0 %v5086_v13 }
 0xec1   :  { %4755 = vmatprep.subr.bf16.mxu0 %v5181_v1 }
 0xec4   :  { %4756 = vmatpush3.bf16.msra.mxu0 %v5087_v14 }
 0xec5   :  { %4787 = vmatprep.subr.bf16.mxu0 %v5181_v1 }
 0xf7a   :  { %v2109_v15 = vpop.f32.mrb[32].mxu0 }
 0xf7b   :  { %v5957_v17 = vadd.f32 %v2109_v15, %v5742_v30  ;;  %v4713_v18 = vpop.f32.mrb[33].mxu0  ;;  %v3906_v30 = vld [vmem:[%s6311_s4 + $0x3] ss:$0 sm:$0xff] }
 0xf7c   :  { %v2112_v19 = vpop.f32.mrb[34].mxu0 }
 0xf7d   :  { %v5960_v20 = vadd.f32 %v2112_v19, %v5744_v33  ;;  %v4714_v21 = vpop.f32.mrb[35].mxu0  ;;  %v2270_v22 = vpop.f32.mrb[52].mxu1 }
 0xf7e   :  { %v2279_v23 = vmul.f32 0.01, %v2270_v22  ;;  %v4739_v24 = vpop.f32.mrb[53].mxu1  ;;  %vm2277_vm12 = vcmp.gt.f32.partialorder %v2270_v22, 0.0 }
 0xf7f   :  { %v2273_v25 = vpop.f32.mrb[54].mxu1  ;;  %v5107_v24 = vld [vmem:[%s6309_s2 + $0x100] sm:$0xff]  }
 0xf80   :  { %vm2278_vm13 = vcmp.gt.f32.partialorder %v2273_v25, 0.0  ;;  %v2280_v26 = vmul.f32 0.01, %v2273_v25  ;;  %v4740_v27 = vpop.f32.mrb[55].mxu1  ;;  %v2281_v28 = vsel %vm2277_vm12, %v2270_v22, %v2279_v23  ;;  %v5156_v22 = vld [vmem:[%s6308_s1] sm:$0xff]  }
 0xf81   :  { %v5105_v23 = vld [vmem:[%s6307_s0 + $0x20] sm:$0xff]   ;;  %v5113_v27 = vld [vmem:[%s6309_s2 + $0x118] sm:$0xff]  }
 0xf82   :  { %v2282_v29 = vsel %vm2278_vm13, %v2273_v25, %v2280_v26  ;;  %v5109_v25 = vld [vmem:[%s6309_s2 + $0x108] sm:$0xff]   ;;  %v5111_v26 = vld [vmem:[%s6309_s2 + $0x110] sm:$0xff]  }
 0xf83   :  { %v2283_v31 = vpack.c.bf16 %v2282_v29, %v2281_v28  ;;  %v5115_v28 = vld [vmem:[%s6309_s2 + $0x120] sm:$0xff]   ;;  %v5117_v29 = vld [vmem:[%s6309_s2 + $0x128] sm:$0xff]  }
 0xf85   :  { %4758 = vmatmul.mubr.bf16.vlgmr.msra.gmra.mrb[36].mxu0 %v2283_v31  ;;  %v5118_v31 = vld [vmem:[%s6317_s10 + $0xf0] sm:$0xff]  }
 0xf86   :  { %4803 = vmatprep.mubr.msk.bf16.mxu0 %vm5182_vm0, %v5181_v1  ;;  %4788 = vmatpush3.bf16.msra.mxu0 %v5097_v54  ;;  %v5123_v54 = vld [vmem:[%s6310_s3 + $0x108] sm:$0xff]  }
 0xf87   :  { %4789 = vmatprep.subr.bf16.mxu0 %v5181_v1 }
 0xf8a   :  { %4790 = vmatpush3.bf16.msra.mxu0 %v5098_v55  ;;  %v5124_v55 = vld [vmem:[%s6310_s3 + $0x110] sm:$0xff]  }
 0xf8b   :  { %4791 = vmatprep.subr.bf16.mxu0 %v5181_v1 }
 0xf8e   :  { %4792 = vmatpush3.bf16.msra.mxu0 %v5099_v56  ;;  %v5125_v56 = vld [vmem:[%s6310_s3 + $0x118] sm:$0xff]  }
 0xf8f   :  { %4793 = vmatprep.subr.bf16.mxu0 %v5181_v1 }
 0xf92   :  { %4794 = vmatpush3.bf16.msra.mxu0 %v5100_v57  ;;  %v5126_v57 = vld [vmem:[%s6310_s3 + $0x120] sm:$0xff]  }
 0xf93   :  { %4795 = vmatprep.subr.bf16.mxu0 %v5181_v1 }
 0xf96   :  { %4796 = vmatpush3.bf16.msra.mxu0 %v5101_v58  ;;  %v5127_v58 = vld [vmem:[%s6310_s3 + $0x128] sm:$0xff]  }
 0xf97   :  { %4797 = vmatprep.subr.bf16.mxu0 %v5181_v1 }
 0xf9a   :  { %4798 = vmatpush3.bf16.msra.mxu0 %v5102_v59  ;;  %v5128_v59 = vld [vmem:[%s6310_s3 + $0x130] sm:$0xff]  }
 0xf9b   :  { %4799 = vmatprep.subr.bf16.mxu0 %v5181_v1 }
 0xf9e   :  { %4800 = vmatpush3.bf16.msra.mxu0 %v5103_v43 }
 0xf9f   :  { %4801 = vmatprep.subr.bf16.mxu0 %v5181_v1 }
 0xfa2   :  { %4802 = vmatpush3.bf16.msra.mxu0 %v5104_v63 }
 0xfa3   :  { %4827 = vmatprep.subr.bf16.mxu0 %v5181_v1 }
0x1058   :  { %v2391_v33 = vpop.f32.mrb[36].mxu0 }
0x1059   :  { %v2392_v32 = vadd.f32 %v3906_v30, %v2391_v33  ;;  %v4759_v34 = vpop.f32.mrb[37].mxu0  ;;  %v5120_v33 = vld [vmem:[%s6317_s10 + $0xf8] sm:$0xff]  }
0x105a   :  { %v2394_v35 = vpop.f32.mrb[38].mxu0  ;;  %v3964_v34 = vld [vmem:[%s6316_s9 + $0x3] ss:$0 sm:$0xff] }
0x105b   :  { %vm2398_vm14 = vcmp.gt.f32.partialorder %v2392_v32, 0.0  ;;  %v2400_v36 = vmul.f32 0.01, %v2392_v32  ;;  %v2395_v37 = vadd.f32 %v3906_v30, %v2394_v35  ;;  %v4760_v38 = vpop.f32.mrb[39].mxu0  ;;  %v5119_v30 = vld [vmem:[%s6309_s2 + $0x130] sm:$0xff]  }
0x105d   :  { %v2402_v39 = vsel %vm2398_vm14, %v2392_v32, %v2400_v36  ;;  %vm2399_vm15 = vcmp.gt.f32.partialorder %v2395_v37, 0.0  ;;  %v2401_v40 = vmul.f32 0.01, %v2395_v37  ;;  %v5121_v32 = vld [vmem:[%s6309_s2 + $0x138] sm:$0xff]  }
0x105e   :  { %3915 = vst [vmem:[%s6319_s12 + $0x30] sm:$0xff] %v2402_v39 }
0x105f   :  { %v2403_v44 = vsel %vm2399_vm15, %v2395_v37, %v2401_v40 }
0x1060   :  { %3916 = vst [vmem:[%s6319_s12 + $0x38] sm:$0xff] %v2403_v44  ;;  %v2410_v45 = vpack.c.bf16 %v2403_v44, %v2402_v39 }
0x1062   :  { %4762 = vmatpush3.bf16.msra.mxu1 %v2410_v45 }
0x1063   :  { %4767 = vmatprep.subr.bf16.mxu1 %v5181_v1 }
0x1065   :  { %4764 = vmatmul.mubr.msk.bf16.vlgmr.msra.gmra.mrb[56].mxu1 %vm60_vm1, %v5088_v46 }
0x1066   :  { %4768 = vmatpush3.bf16.msra.mxu1 %v5089_v47  ;;  %4783 = vmatprep.mubr.msk.bf16.mxu1 %vm5182_vm0, %v5181_v1 }
0x1067   :  { %4769 = vmatprep.subr.bf16.mxu1 %v5181_v1 }
0x106a   :  { %4770 = vmatpush3.bf16.msra.mxu1 %v5090_v16  ;;  %v5122_v16 = vld [vmem:[%s6310_s3 + $0x100] sm:$0xff]  }
0x106b   :  { %4771 = vmatprep.subr.bf16.mxu1 %v5181_v1 }
0x106e   :  { %4772 = vmatpush3.bf16.msra.mxu1 %v5091_v48 }
0x106f   :  { %4773 = vmatprep.subr.bf16.mxu1 %v5181_v1 }
0x1072   :  { %4774 = vmatpush3.bf16.msra.mxu1 %v5092_v49 }
0x1073   :  { %4775 = vmatprep.subr.bf16.mxu1 %v5181_v1 }
0x1076   :  { %4776 = vmatpush3.bf16.msra.mxu1 %v5093_v50 }
0x1077   :  { %4777 = vmatprep.subr.bf16.mxu1 %v5181_v1 }
0x107a   :  { %4778 = vmatpush3.bf16.msra.mxu1 %v5094_v51 }
0x107b   :  { %4779 = vmatprep.subr.bf16.mxu1 %v5181_v1 }
0x107e   :  { %4780 = vmatpush3.bf16.msra.mxu1 %v5095_v52 }
0x107f   :  { %4781 = vmatprep.subr.bf16.mxu1 %v5181_v1 }
0x1082   :  { %4782 = vmatpush3.bf16.msra.mxu1 %v5096_v53 }
0x1083   :  { %4807 = vmatprep.subr.bf16.mxu1 %v5181_v1 }
0x1138   :  { %v2453_v60 = vpop.f32.mrb[56].mxu1 }
0x1139   :  { %v4765_v61 = vpop.f32.mrb[57].mxu1 }
0x113a   :  { %v2456_v62 = vpop.f32.mrb[58].mxu1 }
0x113b   :  { %v2460_v41 = vpack.c.bf16 %v2456_v62, %v2453_v60  ;;  %v4766_v42 = vpop.f32.mrb[59].mxu1  ;;  %v5129_v60 = vld [vmem:[%s6310_s3 + $0x138] sm:$0xff]  }
0x113d   :  { %4784 = vmatmul.mubr.bf16.vlgmr.msra.gmra.mrb[60].mxu1 %v2460_v41 }
0x113e   :  { %4823 = vmatprep.mubr.msk.bf16.mxu1 %vm5182_vm0, %v5181_v1  ;;  %4808 = vmatpush3.bf16.msra.mxu1 %v5106_v0 }
0x113f   :  { %4809 = vmatprep.subr.bf16.mxu1 %v5181_v1 }
0x1142   :  { %4810 = vmatpush3.bf16.msra.mxu1 %v5108_v2 }
0x1143   :  { %4811 = vmatprep.subr.bf16.mxu1 %v5181_v1 }
0x1146   :  { %4812 = vmatpush3.bf16.msra.mxu1 %v5110_v3 }
0x1147   :  { %4813 = vmatprep.subr.bf16.mxu1 %v5181_v1 }
0x114a   :  { %4814 = vmatpush3.bf16.msra.mxu1 %v5112_v4 }
0x114b   :  { %4815 = vmatprep.subr.bf16.mxu1 %v5181_v1 }
0x114e   :  { %4816 = vmatpush3.bf16.msra.mxu1 %v5114_v5 }
0x114f   :  { %4817 = vmatprep.subr.bf16.mxu1 %v5181_v1 }
0x1152   :  { %4818 = vmatpush3.bf16.msra.mxu1 %v5116_v6 }
0x1153   :  { %4819 = vmatprep.subr.bf16.mxu1 %v5181_v1 }
0x1156   :  { %4820 = vmatpush3.bf16.msra.mxu1 %v5118_v31  ;;  %v5137_v31 = vld [vmem:[%s6313_s6 + $0x130] sm:$0xff]  }
0x1157   :  { %4821 = vmatprep.subr.bf16.mxu1 %v5181_v1 }
0x115a   :  { %4822 = vmatpush3.bf16.msra.mxu1 %v5120_v33  ;;  %v5139_v33 = vld [vmem:[%s6315_s8 + $0x100] sm:$0xff]  }
0x115b   :  { %4853 = vmatprep.subr.bf16.mxu1 %v5181_v1 }
0x1210   :  { %v2568_v8 = vpop.f32.mrb[60].mxu1 }
0x1211   :  { %v2569_v9 = vadd.f32 %v3938_v7, %v2568_v8  ;;  %v4785_v10 = vpop.f32.mrb[61].mxu1 }
0x1212   :  { %v2571_v11 = vpop.f32.mrb[62].mxu1 }
0x1213   :  { %v2577_v12 = vmul.f32 0.01, %v2569_v9  ;;  %v2572_v13 = vadd.f32 %v3938_v7, %v2571_v11  ;;  %v4786_v14 = vpop.f32.mrb[63].mxu1  ;;  %vm2575_vm2 = vcmp.gt.f32.partialorder %v2569_v9, 0.0 }
0x1215   :  { %vm2576_vm3 = vcmp.gt.f32.partialorder %v2572_v13, 0.0  ;;  %v2578_v15 = vmul.f32 0.01, %v2572_v13  ;;  %v2579_v18 = vsel %vm2575_vm2, %v2569_v9, %v2577_v12 }
0x1217   :  { %v2580_v19 = vsel %vm2576_vm3, %v2572_v13, %v2578_v15 }
0x1218   :  { %v2581_v21 = vpack.c.bf16 %v2580_v19, %v2579_v18 }
0x121a   :  { %4804 = vmatmul.mubr.bf16.vlgmr.msra.gmra.mrb[40].mxu0 %v2581_v21 }
0x121b   :  { %4828 = vmatpush3.bf16.msra.mxu0 %v5156_v22  ;;  %4829 = vmatprep.mubr.msk.bf16.mxu0 %vm5182_vm0, %v5181_v1 }
0x121c   :  { %4833 = vmatprep.subr.bf16.mxu0 %v5181_v1 }
0x1222   :  { %4830 = vmatmul.mubr.msk.bf16.vlgmr.msra.gmra.mrb[44].mxu0 %vm60_vm1, %v5105_v23  ;;  %v5130_v23 = vld [vmem:[%s6312_s5 + $0x20] sm:$0xff]  }
0x1223   :  { %4834 = vmatpush3.bf16.msra.mxu0 %v5107_v24  ;;  %4849 = vmatprep.mubr.msk.bf16.mxu0 %vm5182_vm0, %v5181_v1  ;;  %v5131_v24 = vld [vmem:[%s6313_s6 + $0x100] sm:$0xff]  }
0x1224   :  { %4835 = vmatprep.subr.bf16.mxu0 %v5181_v1 }
0x1227   :  { %4836 = vmatpush3.bf16.msra.mxu0 %v5109_v25  ;;  %v5132_v25 = vld [vmem:[%s6313_s6 + $0x108] sm:$0xff]  }
0x1228   :  { %4837 = vmatprep.subr.bf16.mxu0 %v5181_v1 }
0x122b   :  { %4838 = vmatpush3.bf16.msra.mxu0 %v5111_v26  ;;  %v5133_v26 = vld [vmem:[%s6313_s6 + $0x110] sm:$0xff]  }
0x122c   :  { %4839 = vmatprep.subr.bf16.mxu0 %v5181_v1 }
0x122f   :  { %4840 = vmatpush3.bf16.msra.mxu0 %v5113_v27  ;;  %v5134_v27 = vld [vmem:[%s6313_s6 + $0x118] sm:$0xff]  }
0x1230   :  { %4841 = vmatprep.subr.bf16.mxu0 %v5181_v1 }
0x1233   :  { %4842 = vmatpush3.bf16.msra.mxu0 %v5115_v28  ;;  %v5135_v28 = vld [vmem:[%s6313_s6 + $0x120] sm:$0xff]  }
0x1234   :  { %4843 = vmatprep.subr.bf16.mxu0 %v5181_v1 }
0x1237   :  { %4844 = vmatpush3.bf16.msra.mxu0 %v5117_v29  ;;  %v5136_v29 = vld [vmem:[%s6313_s6 + $0x128] sm:$0xff]  }
0x1238   :  { %4845 = vmatprep.subr.bf16.mxu0 %v5181_v1 }
0x123b   :  { %4846 = vmatpush3.bf16.msra.mxu0 %v5119_v30  ;;  %v5138_v30 = vld [vmem:[%s6313_s6 + $0x138] sm:$0xff]  }
0x123c   :  { %4847 = vmatprep.subr.bf16.mxu0 %v5181_v1 }
0x123f   :  { %4848 = vmatpush3.bf16.msra.mxu0 %v5121_v32  ;;  %v5140_v32 = vld [vmem:[%s6315_s8 + $0x108] sm:$0xff]  }
0x1240   :  { %4873 = vmatprep.subr.bf16.mxu0 %v5181_v1 }
0x12ed   :  { %v2689_v35 = vpop.f32.mrb[40].mxu0 }
0x12ee   :  { %v2690_v36 = vadd.f32 %v3964_v34, %v2689_v35  ;;  %v4805_v37 = vpop.f32.mrb[41].mxu0  ;;  %v5142_v35 = vld [vmem:[%s6315_s8 + $0x118] sm:$0xff]  }
0x12ef   :  { %v2692_v38 = vpop.f32.mrb[42].mxu0  ;;  %v5144_v37 = vld [vmem:[%s6315_s8 + $0x128] sm:$0xff]  }
0x12f0   :  { %v2698_v39 = vmul.f32 0.01, %v2690_v36  ;;  %v2693_v40 = vadd.f32 %v3964_v34, %v2692_v38  ;;  %v4806_v44 = vpop.f32.mrb[43].mxu0  ;;  %vm2696_vm4 = vcmp.gt.f32.partialorder %v2690_v36, 0.0  ;;  %v5141_v34 = vld [vmem:[%s6315_s8 + $0x110] sm:$0xff]  }
0x12f2   :  { %vm2697_vm5 = vcmp.gt.f32.partialorder %v2693_v40, 0.0  ;;  %v2699_v45 = vmul.f32 0.01, %v2693_v40  ;;  %v2700_v46 = vsel %vm2696_vm4, %v2690_v36, %v2698_v39  ;;  %v5143_v36 = vld [vmem:[%s6315_s8 + $0x120] sm:$0xff]  }
0x12f4   :  { %v2701_v47 = vsel %vm2697_vm5, %v2693_v40, %v2699_v45 }
0x12f5   :  { %v2702_v48 = vpack.c.bf16 %v2701_v47, %v2700_v46  ;;  %v2856_v49 = vpop.f32.mrb[44].mxu0  ;;  %v5145_v46 = vld [vmem:[%s6315_s8 + $0x130] sm:$0xff]   ;;  %v5146_v47 = vld [vmem:[%s6315_s8 + $0x138] sm:$0xff]  }
0x12f6   :  { %v4831_v50 = vpop.f32.mrb[45].mxu0 }
0x12f7   :  { %4824 = vmatmul.mubr.bf16.vlgmr.msra.gmra.mrb[64].mxu1 %v2702_v48  ;;  %v2859_v51 = vpop.f32.mrb[46].mxu0  ;;  %v5148_v48 = vld [vmem:[%s6317_s10 + $0x108] sm:$0xff]   ;;  %v5150_v50 = vld [vmem:[%s6317_s10 + $0x118] sm:$0xff]  }
0x12f8   :  { %v2863_v52 = vpack.c.bf16 %v2859_v51, %v2856_v49  ;;  %v4832_v53 = vpop.f32.mrb[47].mxu0  ;;  %4854 = vmatpush3.bf16.msra.mxu1 %v5122_v16  ;;  %4869 = vmatprep.mubr.msk.bf16.mxu1 %vm5182_vm0, %v5181_v1  ;;  %v5147_v16 = vld [vmem:[%s6317_s10 + $0x100] sm:$0xff]   ;;  %v5149_v49 = vld [vmem:[%s6317_s10 + $0x110] sm:$0xff]  }
0x12f9   :  { %4855 = vmatprep.subr.bf16.mxu1 %v5181_v1  ;;  %v5151_v51 = vld [vmem:[%s6317_s10 + $0x120] sm:$0xff]  }
0x12fa   :  { %4850 = vmatmul.mubr.bf16.vlgmr.msra.gmra.mrb[48].mxu0 %v2863_v52  ;;  %v5152_v52 = vld [vmem:[%s6317_s10 + $0x128] sm:$0xff]   ;;  %v4074_v53 = vld [vmem:[%s6314_s7 + $0x4] ss:$0 sm:$0xff] }
0x12fb   :  { %4875 = vmatprep.mubr.msk.bf16.mxu0 %vm5182_vm0, %v5181_v1 }
0x12fc   :  { %4856 = vmatpush3.bf16.msra.mxu1 %v5123_v54 }
0x12fd   :  { %4857 = vmatprep.subr.bf16.mxu1 %v5181_v1 }
0x1300   :  { %4858 = vmatpush3.bf16.msra.mxu1 %v5124_v55 }
0x1301   :  { %4859 = vmatprep.subr.bf16.mxu1 %v5181_v1 }
0x1304   :  { %4860 = vmatpush3.bf16.msra.mxu1 %v5125_v56 }
0x1305   :  { %4861 = vmatprep.subr.bf16.mxu1 %v5181_v1 }
0x1308   :  { %4862 = vmatpush3.bf16.msra.mxu1 %v5126_v57 }
0x1309   :  { %4863 = vmatprep.subr.bf16.mxu1 %v5181_v1 }
0x130c   :  { %4864 = vmatpush3.bf16.msra.mxu1 %v5127_v58 }
0x130d   :  { %4865 = vmatprep.subr.bf16.mxu1 %v5181_v1 }
0x1310   :  { %4866 = vmatpush3.bf16.msra.mxu1 %v5128_v59 }
0x1311   :  { %4867 = vmatprep.subr.bf16.mxu1 %v5181_v1 }
0x1314   :  { %4868 = vmatpush3.bf16.msra.mxu1 %v5129_v60 }
0x1315   :  { %4899 = vmatprep.subr.bf16.mxu1 %v5181_v1 }
0x13ca   :  { %v2802_v61 = vpop.f32.mrb[64].mxu1 }
0x13cb   :  { %v6165_v62 = vadd.f32 %v2802_v61, %v5957_v17  ;;  %v4825_v41 = vpop.f32.mrb[65].mxu1  ;;  %v4042_v17 = vld [vmem:[%s6311_s4 + $0x4] ss:$0 sm:$0xff] }
0x13cc   :  { %v2805_v42 = vpop.f32.mrb[66].mxu1 }
0x13cd   :  { %v6168_v43 = vadd.f32 %v2805_v42, %v5960_v20  ;;  %v4826_v63 = vpop.f32.mrb[67].mxu1  ;;  %v2963_v0 = vpop.f32.mrb[48].mxu0 }
0x13ce   :  { %v2972_v2 = vmul.f32 0.01, %v2963_v0  ;;  %v4851_v3 = vpop.f32.mrb[49].mxu0  ;;  %vm2970_vm6 = vcmp.gt.f32.partialorder %v2963_v0, 0.0 }
0x13cf   :  { %v2966_v4 = vpop.f32.mrb[50].mxu0  ;;  %v4100_v3 = vld [vmem:[%s6316_s9 + $0x4] ss:$0 sm:$0xff]  ;;  %s5183_s9 = smov [#allocation2]  }
0x13d0   :  { %vm2971_vm7 = vcmp.gt.f32.partialorder %v2966_v4, 0.0  ;;  %v2973_v5 = vmul.f32 0.01, %v2966_v4  ;;  %v4852_v6 = vpop.f32.mrb[51].mxu0  ;;  %v2974_v7 = vsel %vm2970_vm6, %v2963_v0, %v2972_v2  ;;  %v5153_v0 = vld [vmem:[%s6317_s10 + $0x130] sm:$0xff]   ;;  %v5154_v2 = vld [vmem:[%s6317_s10 + $0x138] sm:$0xff]  }
0x13d1   :  { %s3528_s16 = sshll.u32 %s5183_s9, 4  ;;  %s3529_s16 = int_to_ptr.vmem [resolvable:$true] %s3528_s16 }
0x13d2   :  { %v2975_v8 = vsel %vm2971_vm7, %v2966_v4, %v2973_v5  ;;  %p5162_p1 = scmp.lt.s32.totalorder %s3529_s16, %s3529_s16 }
0x13d3   :  { %v2976_v9 = vpack.c.bf16 %v2975_v8, %v2974_v7 }
0x13d5   :  { %4870 = vmatmul.mubr.bf16.vlgmr.msra.gmra.mrb[68].mxu1 %v2976_v9 }
0x13d6   :  { %4915 = vmatprep.mubr.msk.bf16.mxu1 %vm5182_vm0, %v5181_v1  ;;  %4900 = vmatpush3.bf16.msra.mxu1 %v5139_v33 }
0x13d7   :  { %4901 = vmatprep.subr.bf16.mxu1 %v5181_v1 }
0x13da   :  { %4902 = vmatpush3.bf16.msra.mxu1 %v5140_v32 }
0x13db   :  { %4903 = vmatprep.subr.bf16.mxu1 %v5181_v1 }
0x13de   :  { %4904 = vmatpush3.bf16.msra.mxu1 %v5141_v34 }
0x13df   :  { %4905 = vmatprep.subr.bf16.mxu1 %v5181_v1 }
0x13e2   :  { %4906 = vmatpush3.bf16.msra.mxu1 %v5142_v35 }
0x13e3   :  { %4907 = vmatprep.subr.bf16.mxu1 %v5181_v1 }
0x13e6   :  { %4908 = vmatpush3.bf16.msra.mxu1 %v5143_v36 }
0x13e7   :  { %4909 = vmatprep.subr.bf16.mxu1 %v5181_v1 }
0x13ea   :  { %4910 = vmatpush3.bf16.msra.mxu1 %v5144_v37 }
0x13eb   :  { %4911 = vmatprep.subr.bf16.mxu1 %v5181_v1 }
0x13ee   :  { %4912 = vmatpush3.bf16.msra.mxu1 %v5145_v46 }
0x13ef   :  { %4913 = vmatprep.subr.bf16.mxu1 %v5181_v1 }
0x13f2   :  { %4914 = vmatpush3.bf16.msra.mxu1 %v5146_v47 }
0x14a8   :  { %v3084_v20 = vpop.f32.mrb[68].mxu1 }
0x14a9   :  { %v3085_v10 = vadd.f32 %v4042_v17, %v3084_v20  ;;  %v4871_v11 = vpop.f32.mrb[69].mxu1 }
0x14aa   :  { %v3087_v12 = vpop.f32.mrb[70].mxu1 }
0x14ab   :  { %vm3091_vm8 = vcmp.gt.f32.partialorder %v3085_v10, 0.0  ;;  %v3093_v13 = vmul.f32 0.01, %v3085_v10  ;;  %v3088_v14 = vadd.f32 %v4042_v17, %v3087_v12  ;;  %v4872_v15 = vpop.f32.mrb[71].mxu1 }
0x14ad   :  { %v3095_v18 = vsel %vm3091_vm8, %v3085_v10, %v3093_v13  ;;  %vm3092_vm9 = vcmp.gt.f32.partialorder %v3088_v14, 0.0  ;;  %v3094_v19 = vmul.f32 0.01, %v3088_v14  ;;  %v4133_v13 = vld [vmem:[%s6318_s11] ss:$0 sm:$0xff]  ;;  %s5157_s11 = scalar_lea.vmem %s3529_s16, 256 }
0x14ae   :  { %4051 = vst [vmem:[%s6319_s12 + $0x40] sm:$0xff] %v3095_v18  ;;  %p5158_p0 = scmp.ne.s32.totalorder %s3529_s16, %s5157_s11  ;;  %p5163_p2 = scmp.lt.s32.totalorder %s5157_s11, %s5157_s11 }
0x14af   :  { %v3096_v21 = vsel %vm3092_vm9, %v3088_v14, %v3094_v19 }
0x14b0   :  { %4052 = vst [vmem:[%s6319_s12 + $0x48] sm:$0xff] %v3096_v21  ;;  %v3103_v22 = vpack.c.bf16 %v3096_v21, %v3095_v18  ;;  %p5164_p3 = por %p5163_p2, %p5162_p1 }
0x14b2   :  { %4874 = vmatpush3.bf16.msra.mxu0 %v3103_v22  ;;  %p5165_p4 = pnand %p5164_p3, %p5158_p0 }
0x14b3   :  { %4879 = vmatprep.subr.bf16.mxu0 %v5181_v1 }
0x14b5   :  { %4876 = vmatmul.mubr.msk.bf16.vlgmr.msra.gmra.mrb[52].mxu0 %vm60_vm1, %v5130_v23 }
0x14b6   :  { %4880 = vmatpush3.bf16.msra.mxu0 %v5131_v24  ;;  %4895 = vmatprep.mubr.msk.bf16.mxu0 %vm5182_vm0, %v5181_v1 }
0x14b7   :  { %4881 = vmatprep.subr.bf16.mxu0 %v5181_v1 }
0x14ba   :  { %4882 = vmatpush3.bf16.msra.mxu0 %v5132_v25 }
0x14bb   :  { %4883 = vmatprep.subr.bf16.mxu0 %v5181_v1 }
0x14be   :  { %4884 = vmatpush3.bf16.msra.mxu0 %v5133_v26 }
0x14bf   :  { %4885 = vmatprep.subr.bf16.mxu0 %v5181_v1 }
0x14c2   :  { %4886 = vmatpush3.bf16.msra.mxu0 %v5134_v27 }
0x14c3   :  { %4887 = vmatprep.subr.bf16.mxu0 %v5181_v1 }
0x14c6   :  { %4888 = vmatpush3.bf16.msra.mxu0 %v5135_v28 }
0x14c7   :  { %4889 = vmatprep.subr.bf16.mxu0 %v5181_v1 }
0x14ca   :  { %4890 = vmatpush3.bf16.msra.mxu0 %v5136_v29 }
0x14cb   :  { %4891 = vmatprep.subr.bf16.mxu0 %v5181_v1 }
0x14ce   :  { %4892 = vmatpush3.bf16.msra.mxu0 %v5137_v31 }
0x14cf   :  { %4893 = vmatprep.subr.bf16.mxu0 %v5181_v1 }
0x14d2   :  { %4894 = vmatpush3.bf16.msra.mxu0 %v5138_v30 }
0x14d3   :  { %4919 = vmatprep.subr.bf16.mxu0 %v5181_v1 }
0x1588   :  { %v3146_v38 = vpop.f32.mrb[52].mxu0 }
0x1589   :  { %v4877_v39 = vpop.f32.mrb[53].mxu0 }
0x158a   :  { %v3149_v40 = vpop.f32.mrb[54].mxu0 }
0x158b   :  { %v3153_v44 = vpack.c.bf16 %v3149_v40, %v3146_v38  ;;  %v4878_v45 = vpop.f32.mrb[55].mxu0 }
0x158d   :  { %4896 = vmatmul.mubr.bf16.vlgmr.msra.gmra.mrb[56].mxu0 %v3153_v44 }
0x158e   :  { %4935 = vmatprep.mubr.msk.bf16.mxu0 %vm5182_vm0, %v5181_v1  ;;  %4920 = vmatpush3.bf16.msra.mxu0 %v5147_v16 }
0x158f   :  { %4921 = vmatprep.subr.bf16.mxu0 %v5181_v1 }
0x1592   :  { %4922 = vmatpush3.bf16.msra.mxu0 %v5148_v48 }
0x1593   :  { %4923 = vmatprep.subr.bf16.mxu0 %v5181_v1 }
0x1596   :  { %4924 = vmatpush3.bf16.msra.mxu0 %v5149_v49 }
0x1597   :  { %4925 = vmatprep.subr.bf16.mxu0 %v5181_v1 }
0x159a   :  { %4926 = vmatpush3.bf16.msra.mxu0 %v5150_v50 }
0x159b   :  { %4927 = vmatprep.subr.bf16.mxu0 %v5181_v1 }
0x159e   :  { %4928 = vmatpush3.bf16.msra.mxu0 %v5151_v51 }
0x159f   :  { %4929 = vmatprep.subr.bf16.mxu0 %v5181_v1 }
0x15a2   :  { %4930 = vmatpush3.bf16.msra.mxu0 %v5152_v52 }
0x15a3   :  { %4931 = vmatprep.subr.bf16.mxu0 %v5181_v1 }
0x15a6   :  { %4932 = vmatpush3.bf16.msra.mxu0 %v5153_v0 }
0x15a7   :  { %4933 = vmatprep.subr.bf16.mxu0 %v5181_v1 }
0x15aa   :  { %4934 = vmatpush3.bf16.msra.mxu0 %v5154_v2 }
0x1660   :  { %v3261_v54 = vpop.f32.mrb[56].mxu0 }
0x1661   :  { %v3262_v55 = vadd.f32 %v4074_v53, %v3261_v54  ;;  %v4897_v56 = vpop.f32.mrb[57].mxu0 }
0x1662   :  { %v3264_v57 = vpop.f32.mrb[58].mxu0 }
0x1663   :  { %v3270_v58 = vmul.f32 0.01, %v3262_v55  ;;  %v3265_v59 = vadd.f32 %v4074_v53, %v3264_v57  ;;  %v4898_v60 = vpop.f32.mrb[59].mxu0  ;;  %vm3268_vm0 = vcmp.gt.f32.partialorder %v3262_v55, 0.0 }
0x1665   :  { %vm3269_vm1 = vcmp.gt.f32.partialorder %v3265_v59, 0.0  ;;  %v3271_v61 = vmul.f32 0.01, %v3265_v59  ;;  %v3272_v41 = vsel %vm3268_vm0, %v3262_v55, %v3270_v58 }
0x1667   :  { %v3273_v42 = vsel %vm3269_vm1, %v3265_v59, %v3271_v61 }
0x1668   :  { %v3274_v63 = vpack.c.bf16 %v3273_v42, %v3272_v41 }
0x166a   :  { %4916 = vmatmul.mubr.bf16.vlgmr.msra.gmra.mrb[72].mxu1 %v3274_v63 }
0x173d   :  { %v3382_v4 = vpop.f32.mrb[72].mxu1 }
0x173e   :  { %v3383_v5 = vadd.f32 %v4100_v3, %v3382_v4  ;;  %v4917_v6 = vpop.f32.mrb[73].mxu1 }
0x173f   :  { %v3385_v7 = vpop.f32.mrb[74].mxu1 }
0x1740   :  { %v3391_v8 = vmul.f32 0.01, %v3383_v5  ;;  %v3386_v9 = vadd.f32 %v4100_v3, %v3385_v7  ;;  %v4918_v17 = vpop.f32.mrb[75].mxu1  ;;  %vm3389_vm10 = vcmp.gt.f32.partialorder %v3383_v5, 0.0 }
0x1742   :  { %vm3390_vm11 = vcmp.gt.f32.partialorder %v3386_v9, 0.0  ;;  %v3392_v20 = vmul.f32 0.01, %v3386_v9  ;;  %v3393_v1 = vsel %vm3389_vm10, %v3383_v5, %v3391_v8 }
0x1744   :  { %v3394_v10 = vsel %vm3390_vm11, %v3386_v9, %v3392_v20 }
0x1745   :  { %v3395_v11 = vpack.c.bf16 %v3394_v10, %v3393_v1 }
0x1747   :  { %4936 = vmatmul.mubr.bf16.vlgmr.msra.gmra.mrb[60].mxu0 %v3395_v11 }
0x181a   :  { %v3495_v12 = vpop.f32.mrb[60].mxu0 }
0x181b   :  { %v3502_v14 = vadd.f32 %v3495_v12, %v6165_v62  ;;  %v4937_v15 = vpop.f32.mrb[61].mxu0 }
0x181c   :  { %v3498_v18 = vpop.f32.mrb[62].mxu0 }
0x181d   :  { %v3511_v19 = vadd.f32 %v4133_v13, %v3502_v14  ;;  %v3503_v21 = vadd.f32 %v3498_v18, %v6168_v43  ;;  %v4938_v22 = vpop.f32.mrb[63].mxu0 }
0x181f   :  { %vm3513_vm12 = vcmp.gt.f32.partialorder %v3511_v19, 0.0  ;;  %v3515_v23 = vmul.f32 0.01, %v3511_v19  ;;  %v3512_v24 = vadd.f32 %v4133_v13, %v3503_v21 }
0x1821   :  { %v3517_v25 = vsel %vm3513_vm12, %v3511_v19, %v3515_v23  ;;  %vm3514_vm13 = vcmp.gt.f32.partialorder %v3512_v24, 0.0  ;;  %v3516_v26 = vmul.f32 0.01, %v3512_v24 }
0x1822   :  { %3519 = vst [vmem:[#allocation2] sm:$0xff] %v3517_v25 }
0x1823   :  { %v3518_v27 = vsel %vm3514_vm13, %v3512_v24, %v3516_v26 }
0x1824   :  { %3520 = vst [vmem:[#allocation2 + $0x8] sm:$0xff] %v3518_v27 }
0x1825   :  { %5168 = shalt.err (!%p5165_p4)
}
0x1826   :  { %s5169_s5 = scalar_lea.hbm %s6320_s13, 256 }
0x1827   :  { %p5170_p5 = scmp.ne.s32.totalorder %s6320_s13, %s5169_s5  ;;  %p5173_p6 = scmp.lt.u32.totalorder %s5169_s5, %s6320_s13 }
0x1829   :  { %p5175_p7 = pnand %p5173_p6, %p5170_p5 }
0x182b   :  { %5178 = shalt.err (!%p5175_p7)
}
0x182c   :  { %s5184_s21 = smov 128   ;;  %s5185_s22 = smov 8  }
0x182d   :  { %3534 = dma.vmem_to_hbm [thread:$0]  %s3529_s16, 256, %s6320_s13, [#allocation3], %s5184_s21, %s5184_s21, %s5185_s22  }
0x182e   :  { %5179 = dma.done.wait [#allocation3], 256  }
0x182f   :  { %5180 = vsyncadd [#allocation3], 4294967040 }
0x1830   :  { %3540 = vsyncpa [#allocation3], 1 }

</bundles_post_ra>
